<compile_context>
chip_gen: v7x
topology: tpu7x:2x2x1
jax: 0.10.0
libtpu: 0.0.40
codegen_flags: <defaults>
</compile_context>

<pallas_src>
import functools

import numpy as np
import jax
import jax.numpy as jnp
from jax.experimental import pallas as pl
from jax.experimental.pallas import tpu as pltpu


DOT_DTYPE = jnp.bfloat16   # matmul input dtype (f32 accumulation). jnp.float32 => exact parity.
_LN_EPS = 1e-5


def _round_up(x, m):
    return ((x + m - 1) // m) * m


# ----------------------------------------------------------------------------- #
# exact GELU (erf via Abramowitz & Stegun 7.1.26, |err| <= 1.5e-7 ~ f32 eps)
# ----------------------------------------------------------------------------- #
def _erf(x):
    a1, a2, a3, a4, a5 = 0.254829592, -0.284496736, 1.421413741, -1.453152027, 1.061405429
    p = 0.3275911
    ax = jnp.abs(x)
    t = 1.0 / (1.0 + p * ax)
    poly = ((((a5 * t + a4) * t + a3) * t + a2) * t + a1) * t
    y = 1.0 - poly * jnp.exp(-ax * ax)
    return jnp.where(x >= 0, y, -y)


def _gelu(x):
    # PyTorch nn.GELU() default (exact, erf based); kept in f32 on all chips.
    return 0.5 * x * (1.0 + _erf(x * 0.7071067811865476))


# ----------------------------------------------------------------------------- #
# Pallas kernel 1: fused Inception conv1 + GELU + conv2 (SAME padding)
#   Flat-time formulation: for output position t (t = h*period + w),
#     out[t] = bias + sum_b mask_b(t) * sum_a  xpad[t + a*period + b] @ W[a, b]
#   where xpad is the flat sequence zero padded by PAD = pm*(period+1) on each
#   side and mask_b(t) = [0 <= (t mod period) + b - pm < period].
# ----------------------------------------------------------------------------- #
def _make_fused_conv_kernel(M, W, Kmax, C1, C2, PAD, Mpad):
    def kernel(x_ref, m_ref, w1_ref, b1_ref, w2_ref, b2_ref, o_ref, ypad_ref):
        # ---- stage 1: conv1 + bias + GELU -> padded VMEM scratch -------------
        acc1 = jnp.zeros((M, C1), jnp.float32)
        for b in range(Kmax):
            sb = jnp.zeros((M, C1), jnp.float32)
            for a in range(Kmax):
                off = a * W + b                                   # static python int
                sb = sb + jnp.dot(x_ref[off:off + M, :], w1_ref[a * Kmax + b],
                                  preferred_element_type=jnp.float32)
            acc1 = acc1 + m_ref[b] * sb                           # (M,1) lane-broadcast
        y1 = _gelu(acc1 + b1_ref[...])                            # f32 elementwise
        ypad_ref[...] = jnp.zeros((Mpad, C1), ypad_ref.dtype)
        ypad_ref[PAD:PAD + M, :] = y1.astype(ypad_ref.dtype)
        # ---- stage 2: conv2 + bias -> output ---------------------------------
        acc2 = jnp.zeros((M, C2), jnp.float32)
        for b in range(Kmax):
            sb = jnp.zeros((M, C2), jnp.float32)
            for a in range(Kmax):
                off = a * W + b
                sb = sb + jnp.dot(ypad_ref[off:off + M, :], w2_ref[a * Kmax + b],
                                  preferred_element_type=jnp.float32)
            acc2 = acc2 + m_ref[b] * sb
        o_ref[...] = (acc2 + b2_ref[...]).astype(o_ref.dtype)
    return kernel


@functools.lru_cache(maxsize=None)
def _get_fused_conv_fn(Bc, M, W, Kmax, Ci, C1, C2):
    pm = (Kmax - 1) // 2
    PAD = pm * (W + 1)
    Mpad = M + 2 * PAD
    kernel = _make_fused_conv_kernel(M, W, Kmax, C1, C2, PAD, Mpad)
    return pl.pallas_call(
        kernel,
        out_shape=jax.ShapeDtypeStruct((Bc, M, C2), jnp.float32),
        grid=(Bc,),
        in_specs=[
            pl.BlockSpec((None, Mpad, Ci), lambda i: (i, 0, 0)),        # x (one batch elem)
            pl.BlockSpec((Kmax, M, 1), lambda i: (0, 0, 0)),            # per-b masks (shared)
            pl.BlockSpec((Kmax * Kmax, Ci, C1), lambda i: (0, 0, 0)),   # conv1 weight
            pl.BlockSpec((1, C1), lambda i: (0, 0)),                    # conv1 bias
            pl.BlockSpec((Kmax * Kmax, C1, C2), lambda i: (0, 0, 0)),   # conv2 weight
            pl.BlockSpec((1, C2), lambda i: (0, 0)),                    # conv2 bias
        ],
        out_specs=pl.BlockSpec((None, M, C2), lambda i: (i, 0, 0)),
        scratch_shapes=[pltpu.VMEM((Mpad, C1), DOT_DTYPE)],             # fused intermediate
        compiler_params=pltpu.CompilerParams(dimension_semantics=("parallel",)),
    )


def _build_masks(M, W, Kmax):
    pm = (Kmax - 1) // 2
    t_mod = np.arange(M) % W
    m = np.zeros((Kmax, M, 1), np.float32)
    for b in range(Kmax):
        w_src = t_mod + b - pm
        m[b, :, 0] = ((w_src >= 0) & (w_src < W)).astype(np.float32)
    return m


@functools.lru_cache(maxsize=None)
def _get_branch_fn(Bc, T, period, Kmax, Ci, C1, C2):
    """Jitted: flat sequence (Bc,T,Ci) -> fused 2D-conv TimesBlock branch (Bc,T,C2)."""
    pm = (Kmax - 1) // 2
    length = T if T % period == 0 else (T // period + 1) * period
    M, W = length, period
    PAD = pm * (W + 1)
    masks_np = _build_masks(M, W, Kmax)
    conv_fn = _get_fused_conv_fn(Bc, M, W, Kmax, Ci, C1, C2)

    def fn(x_sub, w1, b1, w2, b2):
        masks = jnp.asarray(masks_np)
        # zero pad to `length` at the end (as in PyTorch), plus PAD on both sides
        xp = jnp.pad(x_sub, ((0, 0), (PAD, (length - T) + PAD), (0, 0))).astype(DOT_DTYPE)
        out = conv_fn(xp, masks,
                      w1.reshape(Kmax * Kmax, Ci, C1).astype(DOT_DTYPE),
                      b1.reshape(1, C1),
                      w2.reshape(Kmax * Kmax, C1, C2).astype(DOT_DTYPE),
                      b2.reshape(1, C2))
        return out[:, :T, :]

    return jax.jit(fn)


# ----------------------------------------------------------------------------- #
# Pallas kernel 2: y = LN1(x + gm) ; out = LN2(y + Linear2(GELU(Linear1(y))))
# Tiled over rows; weights VMEM resident.  (dropout = identity)
# ----------------------------------------------------------------------------- #
def _ffn_ln_kernel(x_ref, g_ref, w1_ref, b1_ref, w2_ref, b2_ref,
                   g1_ref, be1_ref, g2_ref, be2_ref, o_ref):
    h = x_ref[...] + g_ref[...]
    mu = jnp.mean(h, axis=-1, keepdims=True)
    var = jnp.mean(jnp.square(h - mu), axis=-1, keepdims=True)
    y = (h - mu) * jax.lax.rsqrt(var + _LN_EPS) * g1_ref[...] + be1_ref[...]
    z = jnp.dot(y.astype(DOT_DTYPE), w1_ref[...],
                preferred_element_type=jnp.float32) + b1_ref[...]
    z = _gelu(z)
    z = jnp.dot(z.astype(DOT_DTYPE), w2_ref[...],
                preferred_element_type=jnp.float32) + b2_ref[...]
    h2 = y + z
    mu2 = jnp.mean(h2, axis=-1, keepdims=True)
    var2 = jnp.mean(jnp.square(h2 - mu2), axis=-1, keepdims=True)
    o_ref[...] = ((h2 - mu2) * jax.lax.rsqrt(var2 + _LN_EPS) * g2_ref[...]
                  + be2_ref[...]).astype(o_ref.dtype)


@functools.lru_cache(maxsize=None)
def _get_ffn_fn(Mtot, D, Dff):
    tm = min(512, _round_up(Mtot, 8))
    grid_m = pl.cdiv(Mtot, tm)
    Mp = grid_m * tm
    call = pl.pallas_call(
        _ffn_ln_kernel,
        out_shape=jax.ShapeDtypeStruct((Mp, D), jnp.float32),
        grid=(grid_m,),
        in_specs=[
            pl.BlockSpec((tm, D), lambda i: (i, 0)),     # x rows
            pl.BlockSpec((tm, D), lambda i: (i, 0)),     # group-module rows
            pl.BlockSpec((D, Dff), lambda i: (0, 0)),    # lin1 W (resident)
            pl.BlockSpec((1, Dff), lambda i: (0, 0)),    # lin1 b
            pl.BlockSpec((Dff, D), lambda i: (0, 0)),    # lin2 W (resident)
            pl.BlockSpec((1, D), lambda i: (0, 0)),      # lin2 b
            pl.BlockSpec((1, D), lambda i: (0, 0)),      # ln1 gamma
            pl.BlockSpec((1, D), lambda i: (0, 0)),      # ln1 beta
            pl.BlockSpec((1, D), lambda i: (0, 0)),      # ln2 gamma
            pl.BlockSpec((1, D), lambda i: (0, 0)),      # ln2 beta
        ],
        out_specs=pl.BlockSpec((tm, D), lambda i: (i, 0)),
        compiler_params=pltpu.CompilerParams(dimension_semantics=("parallel",)),
    )

    def fn(x2d, g2d, w1, b1, w2, b2, ln1_g, ln1_b, ln2_g, ln2_b):
        pad = Mp - Mtot
        if pad:
            x2d = jnp.pad(x2d, ((0, pad), (0, 0)))
            g2d = jnp.pad(g2d, ((0, pad), (0, 0)))
        out = call(x2d, g2d,
                   w1.astype(DOT_DTYPE), b1.reshape(1, Dff),
                   w2.astype(DOT_DTYPE), b2.reshape(1, D),
                   ln1_g.reshape(1, D), ln1_b.reshape(1, D),
                   ln2_g.reshape(1, D), ln2_b.reshape(1, D))
        return out[:Mtot]

    return jax.jit(fn)


def ffn_layernorm(x2d, g2d, p):
    Mtot, D = x2d.shape
    Dff = p['lin1_w'].shape[1]
    fn = _get_ffn_fn(Mtot, D, Dff)
    return fn(x2d, g2d, p['lin1_w'], p['lin1_b'], p['lin2_w'], p['lin2_b'],
              p['ln1_g'], p['ln1_b'], p['ln2_g'], p['ln2_b'])


# ----------------------------------------------------------------------------- #
# FFT_for_Period for ALL groups with a single device->host round trip
# (matches the PyTorch .detach().cpu().numpy() behaviour, but only one sync/forward).
# ----------------------------------------------------------------------------- #
def fft_for_period_groups(x, num_groups, k):
    B, T, D = x.shape
    ds = D // num_groups
    amp = jnp.abs(jnp.fft.rfft(x.astype(jnp.float32), axis=1))        # (B, F, D)
    amp_g = amp.reshape(B, amp.shape[1], num_groups, ds)
    freq = amp_g.mean(axis=0).mean(axis=-1)                           # (F, G)
    freq = freq.at[0, :].set(0.0)
    _, top = jax.lax.top_k(jnp.transpose(freq), k)                    # (G, k)
    pw_all = amp_g.mean(axis=-1)                                      # (B, F, G)
    # TODO(synk): fully on-device variant would need lax.switch over a static period
    # set; the reference module itself forces this host sync via .cpu().numpy().
    top_np = np.asarray(jax.device_get(top))                          # one host round trip
    periods = T // np.maximum(top_np, 1)                              # (G, k) host ints
    pw = jnp.stack([pw_all[:, top_np[g], g] for g in range(num_groups)], axis=1)  # (B,G,k)
    return periods, pw


# ----------------------------------------------------------------------------- #
# GroupTimesBlock forward
# ----------------------------------------------------------------------------- #
def group_times_block(x, p, cfg):
    B, T, D = x.shape
    G = cfg['num_groups']
    k = cfg['top_k']
    nk = cfg['num_kernels']
    Kmax = 2 * nk - 1
    ds = D // G
    C1 = p['conv1_w'].shape[-1]

    periods, pw = fft_for_period_groups(x, G, k)          # periods on host, pw on device
    xg = x.reshape(B, T, G, ds)

    # Bucket (group, top-k slot) pairs by period: TimesBlock weights are shared across
    # groups, so branches with equal periods run as ONE pallas_call with groups folded
    # into the batch/grid dimension.
    buckets = {}
    for g in range(G):
        for i in range(k):
            buckets.setdefault(int(periods[g, i]), []).append((g, i))

    branch_out = {}
    for period, pairs in buckets.items():
        xs = jnp.stack([xg[:, :, g, :] for g, _ in pairs], axis=0)    # (nb, B, T, ds)
        nb = len(pairs)
        xs = xs.reshape(nb * B, T, ds)
        fn = _get_branch_fn(nb * B, T, period, Kmax, ds, C1, ds)
        out = fn(xs, p['conv1_w'], p['conv1_b'], p['conv2_w'], p['conv2_b'])
        out = out.reshape(nb, B, T, ds)
        for j, (g, i) in enumerate(pairs):
            branch_out[(g, i)] = out[j]

    # per-group softmax-weighted aggregation over the k period branches
    w = jax.nn.softmax(pw, axis=-1)                                   # (B, G, k)
    outs = []
    for g in range(G):
        res_g = jnp.stack([branch_out[(g, i)] for i in range(k)], axis=-1)   # (B,T,ds,k)
        outs.append(jnp.sum(res_g * w[:, g][:, None, None, :], axis=-1))
    gm = jnp.concatenate(outs, axis=-1)                               # (B, T, D)

    out2d = ffn_layernorm(x.reshape(B * T, D), gm.reshape(B * T, D), p)
    return out2d.reshape(B, T, D)


# ----------------------------------------------------------------------------- #
# Deterministic parameter construction
# ----------------------------------------------------------------------------- #
def make_inception_eff_weights(key, ci, co, num_kernels):
    """Fold the num_kernels convs (sizes 2i+1, pad i) into one averaged Kmax conv (exact)."""
    Kmax = 2 * (num_kernels - 1) + 1
    pm = num_kernels - 1
    w_eff = jnp.zeros((Kmax, Kmax, ci, co), jnp.float32)
    b_eff = jnp.zeros((co,), jnp.float32)
    for i in range(num_kernels):
        ksz = 2 * i + 1
        key, kw, kb = jax.random.split(key, 3)
        bound = 1.0 / np.sqrt(ci * ksz * ksz)
        w = jax.random.uniform(kw, (ksz, ksz, ci, co), jnp.float32, -bound, bound)
        b = jax.random.uniform(kb, (co,), jnp.float32, -bound, bound)
        off = pm - i
        w_eff = w_eff.at[off:off + ksz, off:off + ksz].add(w)
        b_eff = b_eff + b
    return w_eff / num_kernels, b_eff / num_kernels, key


def init_params(key, cfg):
    d_model, d_ff = cfg['d_model'], cfg['d_ff']
    d_sub = d_model // cfg['num_groups']
    nk = cfg['num_kernels']
    p = {}
    # TimesBlock conv (shared across groups): Inception(d_sub->d_sub), GELU, Inception(d_sub->d_sub)
    p['conv1_w'], p['conv1_b'], key = make_inception_eff_weights(key, d_sub, d_sub, nk)
    p['conv2_w'], p['conv2_b'], key = make_inception_eff_weights(key, d_sub, d_sub, nk)
    key, k1, k2, k3, k4, k5, k6, k7, k8 = jax.random.split(key, 9)
    b1 = 1.0 / np.sqrt(d_model)
    b2 = 1.0 / np.sqrt(d_ff)
    p['lin1_w'] = jax.random.uniform(k1, (d_model, d_ff), jnp.float32, -b1, b1)
    p['lin1_b'] = jax.random.uniform(k2, (d_ff,), jnp.float32, -b1, b1)
    p['lin2_w'] = jax.random.uniform(k3, (d_ff, d_model), jnp.float32, -b2, b2)
    p['lin2_b'] = jax.random.uniform(k4, (d_model,), jnp.float32, -b2, b2)
    p['ln1_g'] = 1.0 + 0.05 * jax.random.normal(k5, (d_model,), jnp.float32)
    p['ln1_b'] = 0.05 * jax.random.normal(k6, (d_model,), jnp.float32)
    p['ln2_g'] = 1.0 + 0.05 * jax.random.normal(k7, (d_model,), jnp.float32)
    p['ln2_b'] = 0.05 * jax.random.normal(k8, (d_model,), jnp.float32)
    return p


# ----------------------------------------------------------------------------- #
if __name__ == "__main__":
    cfg = dict(seq_len=16, pred_len=0, top_k=2, d_model=32, d_ff=64,
               num_groups=2, num_kernels=3, dropout=0.1)   # dropout: identity (eval)
    key = jax.random.PRNGKey(0)
    key, kx, kp = jax.random.split(key, 3)
    B = 2
    T = cfg['seq_len'] + cfg['pred_len']
    x = jax.random.normal(kx, (B, T, cfg['d_model']), jnp.float32)
    params = init_params(kp, cfg)

    out = group_times_block(x, params, cfg)
    out = jax.block_until_ready(out)
    assert out.shape == (B, T, cfg['d_model'])
    assert bool(jnp.all(jnp.isfinite(out)))
    print("KERNEL_OK")
</pallas_src>

<mosaic_0001>
module attributes {stable_mosaic.version = 11 : i64} {
  func.func @kernel(%arg0: i32, %arg1: memref<1x28x16xbf16, #tpu.memory_space<vmem>>, %arg2: memref<5x16x1xf32, #tpu.memory_space<vmem>>, %arg3: memref<25x16x16xbf16, #tpu.memory_space<vmem>>, %arg4: memref<1x16xf32, #tpu.memory_space<vmem>>, %arg5: memref<25x16x16xbf16, #tpu.memory_space<vmem>>, %arg6: memref<1x16xf32, #tpu.memory_space<vmem>>, %arg7: memref<1x16x16xf32, #tpu.memory_space<vmem>>, %arg8: memref<28x16xbf16, #tpu.memory_space<vmem>>) attributes {dimension_semantics = [#tpu.dimension_semantics<parallel>], iteration_bounds = array<i64: 2>, scalar_prefetch = 0 : i64, scratch_operands = 1 : i64, tpu.core_type = #tpu.core_type<tc>, window_params = [{transform_indices = @transform_0, window_bounds = array<i64: 1, 28, 16>}, {pipeline_mode = #tpu.pipeline_mode<synchronous>, transform_indices = @transform_1, window_bounds = array<i64: 5, 16, 1>}, {pipeline_mode = #tpu.pipeline_mode<synchronous>, transform_indices = @transform_2, window_bounds = array<i64: 25, 16, 16>}, {pipeline_mode = #tpu.pipeline_mode<synchronous>, transform_indices = @transform_3, window_bounds = array<i64: 1, 16>}, {pipeline_mode = #tpu.pipeline_mode<synchronous>, transform_indices = @transform_4, window_bounds = array<i64: 25, 16, 16>}, {pipeline_mode = #tpu.pipeline_mode<synchronous>, transform_indices = @transform_5, window_bounds = array<i64: 1, 16>}, {transform_indices = @transform_6, window_bounds = array<i64: 1, 16, 16>}]} {
    %cst = arith.constant 0.000000e+00 : f32
    %0 = vector.broadcast %cst : f32 to vector<16x16xf32>
    %cst_0 = arith.constant 0.000000e+00 : f32
    %1 = vector.broadcast %cst_0 : f32 to vector<16x16xf32>
    %c0 = arith.constant 0 : index
    %c0_1 = arith.constant 0 : index
    %c0_2 = arith.constant 0 : index
    %2 = vector.load %arg1[%c0, %c0_1, %c0_2] : memref<1x28x16xbf16, #tpu.memory_space<vmem>>, vector<1x16x16xbf16>
    %3 = vector.shape_cast %2 : vector<1x16x16xbf16> to vector<16x16xbf16>
    %c0_3 = arith.constant 0 : index
    %c0_4 = arith.constant 0 : index
    %c0_5 = arith.constant 0 : index
    %4 = vector.load %arg3[%c0_3, %c0_4, %c0_5] : memref<25x16x16xbf16, #tpu.memory_space<vmem>>, vector<1x16x16xbf16>
    %5 = vector.shape_cast %4 : vector<1x16x16xbf16> to vector<16x16xbf16>
    %cst_6 = arith.constant dense<0.000000e+00> : vector<16x16xf32>
    %6 = tpu.matmul %3, %5, %cst_6 {dimension_numbers = #tpu.dot_dimension_numbers<[1], [0], [0], [1], [0, 0, 1, 1], [], []>} : vector<16x16xbf16>, vector<16x16xbf16>, vector<16x16xf32> -> vector<16x16xf32>
    %7 = arith.addf %1, %6 : vector<16x16xf32>
    %c0_7 = arith.constant 0 : index
    %c2 = arith.constant 2 : index
    %c0_8 = arith.constant 0 : index
    %8 = vector.load %arg1[%c0_7, %c2, %c0_8] : memref<1x28x16xbf16, #tpu.memory_space<vmem>>, vector<1x16x16xbf16>
    %9 = vector.shape_cast %8 : vector<1x16x16xbf16> to vector<16x16xbf16>
    %c5 = arith.constant 5 : index
    %c0_9 = arith.constant 0 : index
    %c0_10 = arith.constant 0 : index
    %10 = vector.load %arg3[%c5, %c0_9, %c0_10] : memref<25x16x16xbf16, #tpu.memory_space<vmem>>, vector<1x16x16xbf16>
    %11 = vector.shape_cast %10 : vector<1x16x16xbf16> to vector<16x16xbf16>
    %cst_11 = arith.constant dense<0.000000e+00> : vector<16x16xf32>
    %12 = tpu.matmul %9, %11, %cst_11 {dimension_numbers = #tpu.dot_dimension_numbers<[1], [0], [0], [1], [0, 0, 1, 1], [], []>} : vector<16x16xbf16>, vector<16x16xbf16>, vector<16x16xf32> -> vector<16x16xf32>
    %13 = arith.addf %7, %12 : vector<16x16xf32>
    %c0_12 = arith.constant 0 : index
    %c4 = arith.constant 4 : index
    %c0_13 = arith.constant 0 : index
    %14 = vector.load %arg1[%c0_12, %c4, %c0_13] : memref<1x28x16xbf16, #tpu.memory_space<vmem>>, vector<1x16x16xbf16>
    %15 = vector.shape_cast %14 : vector<1x16x16xbf16> to vector<16x16xbf16>
    %c10 = arith.constant 10 : index
    %c0_14 = arith.constant 0 : index
    %c0_15 = arith.constant 0 : index
    %16 = vector.load %arg3[%c10, %c0_14, %c0_15] : memref<25x16x16xbf16, #tpu.memory_space<vmem>>, vector<1x16x16xbf16>
    %17 = vector.shape_cast %16 : vector<1x16x16xbf16> to vector<16x16xbf16>
    %cst_16 = arith.constant dense<0.000000e+00> : vector<16x16xf32>
    %18 = tpu.matmul %15, %17, %cst_16 {dimension_numbers = #tpu.dot_dimension_numbers<[1], [0], [0], [1], [0, 0, 1, 1], [], []>} : vector<16x16xbf16>, vector<16x16xbf16>, vector<16x16xf32> -> vector<16x16xf32>
    %19 = arith.addf %13, %18 : vector<16x16xf32>
    %c0_17 = arith.constant 0 : index
    %c6 = arith.constant 6 : index
    %c0_18 = arith.constant 0 : index
    %20 = vector.load %arg1[%c0_17, %c6, %c0_18] : memref<1x28x16xbf16, #tpu.memory_space<vmem>>, vector<1x16x16xbf16>
    %21 = vector.shape_cast %20 : vector<1x16x16xbf16> to vector<16x16xbf16>
    %c15 = arith.constant 15 : index
    %c0_19 = arith.constant 0 : index
    %c0_20 = arith.constant 0 : index
    %22 = vector.load %arg3[%c15, %c0_19, %c0_20] : memref<25x16x16xbf16, #tpu.memory_space<vmem>>, vector<1x16x16xbf16>
    %23 = vector.shape_cast %22 : vector<1x16x16xbf16> to vector<16x16xbf16>
    %cst_21 = arith.constant dense<0.000000e+00> : vector<16x16xf32>
    %24 = tpu.matmul %21, %23, %cst_21 {dimension_numbers = #tpu.dot_dimension_numbers<[1], [0], [0], [1], [0, 0, 1, 1], [], []>} : vector<16x16xbf16>, vector<16x16xbf16>, vector<16x16xf32> -> vector<16x16xf32>
    %25 = arith.addf %19, %24 : vector<16x16xf32>
    %c0_22 = arith.constant 0 : index
    %c8 = arith.constant 8 : index
    %c0_23 = arith.constant 0 : index
    %26 = vector.load %arg1[%c0_22, %c8, %c0_23] : memref<1x28x16xbf16, #tpu.memory_space<vmem>>, vector<1x16x16xbf16>
    %27 = vector.shape_cast %26 : vector<1x16x16xbf16> to vector<16x16xbf16>
    %c20 = arith.constant 20 : index
    %c0_24 = arith.constant 0 : index
    %c0_25 = arith.constant 0 : index
    %28 = vector.load %arg3[%c20, %c0_24, %c0_25] : memref<25x16x16xbf16, #tpu.memory_space<vmem>>, vector<1x16x16xbf16>
    %29 = vector.shape_cast %28 : vector<1x16x16xbf16> to vector<16x16xbf16>
    %cst_26 = arith.constant dense<0.000000e+00> : vector<16x16xf32>
    %30 = tpu.matmul %27, %29, %cst_26 {dimension_numbers = #tpu.dot_dimension_numbers<[1], [0], [0], [1], [0, 0, 1, 1], [], []>} : vector<16x16xbf16>, vector<16x16xbf16>, vector<16x16xf32> -> vector<16x16xf32>
    %31 = arith.addf %25, %30 : vector<16x16xf32>
    %c0_27 = arith.constant 0 : index
    %c0_28 = arith.constant 0 : index
    %c0_29 = arith.constant 0 : index
    %32 = vector.load %arg2[%c0_27, %c0_28, %c0_29] : memref<5x16x1xf32, #tpu.memory_space<vmem>>, vector<1x16x1xf32>
    %33 = vector.shape_cast %32 : vector<1x16x1xf32> to vector<16x1xf32>
    %34 = vector.broadcast %33 : vector<16x1xf32> to vector<16x16xf32>
    %35 = arith.mulf %34, %31 : vector<16x16xf32>
    %36 = arith.addf %0, %35 : vector<16x16xf32>
    %cst_30 = arith.constant 0.000000e+00 : f32
    %37 = vector.broadcast %cst_30 : f32 to vector<16x16xf32>
    %c0_31 = arith.constant 0 : index
    %c1 = arith.constant 1 : index
    %c0_32 = arith.constant 0 : index
    %38 = vector.load %arg1[%c0_31, %c1, %c0_32] : memref<1x28x16xbf16, #tpu.memory_space<vmem>>, vector<1x16x16xbf16>
    %39 = vector.shape_cast %38 : vector<1x16x16xbf16> to vector<16x16xbf16>
    %c1_33 = arith.constant 1 : index
    %c0_34 = arith.constant 0 : index
    %c0_35 = arith.constant 0 : index
    %40 = vector.load %arg3[%c1_33, %c0_34, %c0_35] : memref<25x16x16xbf16, #tpu.memory_space<vmem>>, vector<1x16x16xbf16>
    %41 = vector.shape_cast %40 : vector<1x16x16xbf16> to vector<16x16xbf16>
    %cst_36 = arith.constant dense<0.000000e+00> : vector<16x16xf32>
    %42 = tpu.matmul %39, %41, %cst_36 {dimension_numbers = #tpu.dot_dimension_numbers<[1], [0], [0], [1], [0, 0, 1, 1], [], []>} : vector<16x16xbf16>, vector<16x16xbf16>, vector<16x16xf32> -> vector<16x16xf32>
    %43 = arith.addf %37, %42 : vector<16x16xf32>
    %c0_37 = arith.constant 0 : index
    %c3 = arith.constant 3 : index
    %c0_38 = arith.constant 0 : index
    %44 = vector.load %arg1[%c0_37, %c3, %c0_38] : memref<1x28x16xbf16, #tpu.memory_space<vmem>>, vector<1x16x16xbf16>
    %45 = vector.shape_cast %44 : vector<1x16x16xbf16> to vector<16x16xbf16>
    %c6_39 = arith.constant 6 : index
    %c0_40 = arith.constant 0 : index
    %c0_41 = arith.constant 0 : index
    %46 = vector.load %arg3[%c6_39, %c0_40, %c0_41] : memref<25x16x16xbf16, #tpu.memory_space<vmem>>, vector<1x16x16xbf16>
    %47 = vector.shape_cast %46 : vector<1x16x16xbf16> to vector<16x16xbf16>
    %cst_42 = arith.constant dense<0.000000e+00> : vector<16x16xf32>
    %48 = tpu.matmul %45, %47, %cst_42 {dimension_numbers = #tpu.dot_dimension_numbers<[1], [0], [0], [1], [0, 0, 1, 1], [], []>} : vector<16x16xbf16>, vector<16x16xbf16>, vector<16x16xf32> -> vector<16x16xf32>
    %49 = arith.addf %43, %48 : vector<16x16xf32>
    %c0_43 = arith.constant 0 : index
    %c5_44 = arith.constant 5 : index
    %c0_45 = arith.constant 0 : index
    %50 = vector.load %arg1[%c0_43, %c5_44, %c0_45] : memref<1x28x16xbf16, #tpu.memory_space<vmem>>, vector<1x16x16xbf16>
    %51 = vector.shape_cast %50 : vector<1x16x16xbf16> to vector<16x16xbf16>
    %c11 = arith.constant 11 : index
    %c0_46 = arith.constant 0 : index
    %c0_47 = arith.constant 0 : index
    %52 = vector.load %arg3[%c11, %c0_46, %c0_47] : memref<25x16x16xbf16, #tpu.memory_space<vmem>>, vector<1x16x16xbf16>
    %53 = vector.shape_cast %52 : vector<1x16x16xbf16> to vector<16x16xbf16>
    %cst_48 = arith.constant dense<0.000000e+00> : vector<16x16xf32>
    %54 = tpu.matmul %51, %53, %cst_48 {dimension_numbers = #tpu.dot_dimension_numbers<[1], [0], [0], [1], [0, 0, 1, 1], [], []>} : vector<16x16xbf16>, vector<16x16xbf16>, vector<16x16xf32> -> vector<16x16xf32>
    %55 = arith.addf %49, %54 : vector<16x16xf32>
    %c0_49 = arith.constant 0 : index
    %c7 = arith.constant 7 : index
    %c0_50 = arith.constant 0 : index
    %56 = vector.load %arg1[%c0_49, %c7, %c0_50] : memref<1x28x16xbf16, #tpu.memory_space<vmem>>, vector<1x16x16xbf16>
    %57 = vector.shape_cast %56 : vector<1x16x16xbf16> to vector<16x16xbf16>
    %c16 = arith.constant 16 : index
    %c0_51 = arith.constant 0 : index
    %c0_52 = arith.constant 0 : index
    %58 = vector.load %arg3[%c16, %c0_51, %c0_52] : memref<25x16x16xbf16, #tpu.memory_space<vmem>>, vector<1x16x16xbf16>
    %59 = vector.shape_cast %58 : vector<1x16x16xbf16> to vector<16x16xbf16>
    %cst_53 = arith.constant dense<0.000000e+00> : vector<16x16xf32>
    %60 = tpu.matmul %57, %59, %cst_53 {dimension_numbers = #tpu.dot_dimension_numbers<[1], [0], [0], [1], [0, 0, 1, 1], [], []>} : vector<16x16xbf16>, vector<16x16xbf16>, vector<16x16xf32> -> vector<16x16xf32>
    %61 = arith.addf %55, %60 : vector<16x16xf32>
    %c0_54 = arith.constant 0 : index
    %c9 = arith.constant 9 : index
    %c0_55 = arith.constant 0 : index
    %62 = vector.load %arg1[%c0_54, %c9, %c0_55] : memref<1x28x16xbf16, #tpu.memory_space<vmem>>, vector<1x16x16xbf16>
    %63 = vector.shape_cast %62 : vector<1x16x16xbf16> to vector<16x16xbf16>
    %c21 = arith.constant 21 : index
    %c0_56 = arith.constant 0 : index
    %c0_57 = arith.constant 0 : index
    %64 = vector.load %arg3[%c21, %c0_56, %c0_57] : memref<25x16x16xbf16, #tpu.memory_space<vmem>>, vector<1x16x16xbf16>
    %65 = vector.shape_cast %64 : vector<1x16x16xbf16> to vector<16x16xbf16>
    %cst_58 = arith.constant dense<0.000000e+00> : vector<16x16xf32>
    %66 = tpu.matmul %63, %65, %cst_58 {dimension_numbers = #tpu.dot_dimension_numbers<[1], [0], [0], [1], [0, 0, 1, 1], [], []>} : vector<16x16xbf16>, vector<16x16xbf16>, vector<16x16xf32> -> vector<16x16xf32>
    %67 = arith.addf %61, %66 : vector<16x16xf32>
    %c1_59 = arith.constant 1 : index
    %c0_60 = arith.constant 0 : index
    %c0_61 = arith.constant 0 : index
    %68 = vector.load %arg2[%c1_59, %c0_60, %c0_61] : memref<5x16x1xf32, #tpu.memory_space<vmem>>, vector<1x16x1xf32>
    %69 = vector.shape_cast %68 : vector<1x16x1xf32> to vector<16x1xf32>
    %70 = vector.broadcast %69 : vector<16x1xf32> to vector<16x16xf32>
    %71 = arith.mulf %70, %67 : vector<16x16xf32>
    %72 = arith.addf %36, %71 : vector<16x16xf32>
    %cst_62 = arith.constant 0.000000e+00 : f32
    %73 = vector.broadcast %cst_62 : f32 to vector<16x16xf32>
    %c0_63 = arith.constant 0 : index
    %c2_64 = arith.constant 2 : index
    %c0_65 = arith.constant 0 : index
    %74 = vector.load %arg1[%c0_63, %c2_64, %c0_65] : memref<1x28x16xbf16, #tpu.memory_space<vmem>>, vector<1x16x16xbf16>
    %75 = vector.shape_cast %74 : vector<1x16x16xbf16> to vector<16x16xbf16>
    %c2_66 = arith.constant 2 : index
    %c0_67 = arith.constant 0 : index
    %c0_68 = arith.constant 0 : index
    %76 = vector.load %arg3[%c2_66, %c0_67, %c0_68] : memref<25x16x16xbf16, #tpu.memory_space<vmem>>, vector<1x16x16xbf16>
    %77 = vector.shape_cast %76 : vector<1x16x16xbf16> to vector<16x16xbf16>
    %cst_69 = arith.constant dense<0.000000e+00> : vector<16x16xf32>
    %78 = tpu.matmul %75, %77, %cst_69 {dimension_numbers = #tpu.dot_dimension_numbers<[1], [0], [0], [1], [0, 0, 1, 1], [], []>} : vector<16x16xbf16>, vector<16x16xbf16>, vector<16x16xf32> -> vector<16x16xf32>
    %79 = arith.addf %73, %78 : vector<16x16xf32>
    %c0_70 = arith.constant 0 : index
    %c4_71 = arith.constant 4 : index
    %c0_72 = arith.constant 0 : index
    %80 = vector.load %arg1[%c0_70, %c4_71, %c0_72] : memref<1x28x16xbf16, #tpu.memory_space<vmem>>, vector<1x16x16xbf16>
    %81 = vector.shape_cast %80 : vector<1x16x16xbf16> to vector<16x16xbf16>
    %c7_73 = arith.constant 7 : index
    %c0_74 = arith.constant 0 : index
    %c0_75 = arith.constant 0 : index
    %82 = vector.load %arg3[%c7_73, %c0_74, %c0_75] : memref<25x16x16xbf16, #tpu.memory_space<vmem>>, vector<1x16x16xbf16>
    %83 = vector.shape_cast %82 : vector<1x16x16xbf16> to vector<16x16xbf16>
    %cst_76 = arith.constant dense<0.000000e+00> : vector<16x16xf32>
    %84 = tpu.matmul %81, %83, %cst_76 {dimension_numbers = #tpu.dot_dimension_numbers<[1], [0], [0], [1], [0, 0, 1, 1], [], []>} : vector<16x16xbf16>, vector<16x16xbf16>, vector<16x16xf32> -> vector<16x16xf32>
    %85 = arith.addf %79, %84 : vector<16x16xf32>
    %c0_77 = arith.constant 0 : index
    %c6_78 = arith.constant 6 : index
    %c0_79 = arith.constant 0 : index
    %86 = vector.load %arg1[%c0_77, %c6_78, %c0_79] : memref<1x28x16xbf16, #tpu.memory_space<vmem>>, vector<1x16x16xbf16>
    %87 = vector.shape_cast %86 : vector<1x16x16xbf16> to vector<16x16xbf16>
    %c12 = arith.constant 12 : index
    %c0_80 = arith.constant 0 : index
    %c0_81 = arith.constant 0 : index
    %88 = vector.load %arg3[%c12, %c0_80, %c0_81] : memref<25x16x16xbf16, #tpu.memory_space<vmem>>, vector<1x16x16xbf16>
    %89 = vector.shape_cast %88 : vector<1x16x16xbf16> to vector<16x16xbf16>
    %cst_82 = arith.constant dense<0.000000e+00> : vector<16x16xf32>
    %90 = tpu.matmul %87, %89, %cst_82 {dimension_numbers = #tpu.dot_dimension_numbers<[1], [0], [0], [1], [0, 0, 1, 1], [], []>} : vector<16x16xbf16>, vector<16x16xbf16>, vector<16x16xf32> -> vector<16x16xf32>
    %91 = arith.addf %85, %90 : vector<16x16xf32>
    %c0_83 = arith.constant 0 : index
    %c8_84 = arith.constant 8 : index
    %c0_85 = arith.constant 0 : index
    %92 = vector.load %arg1[%c0_83, %c8_84, %c0_85] : memref<1x28x16xbf16, #tpu.memory_space<vmem>>, vector<1x16x16xbf16>
    %93 = vector.shape_cast %92 : vector<1x16x16xbf16> to vector<16x16xbf16>
    %c17 = arith.constant 17 : index
    %c0_86 = arith.constant 0 : index
    %c0_87 = arith.constant 0 : index
    %94 = vector.load %arg3[%c17, %c0_86, %c0_87] : memref<25x16x16xbf16, #tpu.memory_space<vmem>>, vector<1x16x16xbf16>
    %95 = vector.shape_cast %94 : vector<1x16x16xbf16> to vector<16x16xbf16>
    %cst_88 = arith.constant dense<0.000000e+00> : vector<16x16xf32>
    %96 = tpu.matmul %93, %95, %cst_88 {dimension_numbers = #tpu.dot_dimension_numbers<[1], [0], [0], [1], [0, 0, 1, 1], [], []>} : vector<16x16xbf16>, vector<16x16xbf16>, vector<16x16xf32> -> vector<16x16xf32>
    %97 = arith.addf %91, %96 : vector<16x16xf32>
    %c0_89 = arith.constant 0 : index
    %c10_90 = arith.constant 10 : index
    %c0_91 = arith.constant 0 : index
    %98 = vector.load %arg1[%c0_89, %c10_90, %c0_91] : memref<1x28x16xbf16, #tpu.memory_space<vmem>>, vector<1x16x16xbf16>
    %99 = vector.shape_cast %98 : vector<1x16x16xbf16> to vector<16x16xbf16>
    %c22 = arith.constant 22 : index
    %c0_92 = arith.constant 0 : index
    %c0_93 = arith.constant 0 : index
    %100 = vector.load %arg3[%c22, %c0_92, %c0_93] : memref<25x16x16xbf16, #tpu.memory_space<vmem>>, vector<1x16x16xbf16>
    %101 = vector.shape_cast %100 : vector<1x16x16xbf16> to vector<16x16xbf16>
    %cst_94 = arith.constant dense<0.000000e+00> : vector<16x16xf32>
    %102 = tpu.matmul %99, %101, %cst_94 {dimension_numbers = #tpu.dot_dimension_numbers<[1], [0], [0], [1], [0, 0, 1, 1], [], []>} : vector<16x16xbf16>, vector<16x16xbf16>, vector<16x16xf32> -> vector<16x16xf32>
    %103 = arith.addf %97, %102 : vector<16x16xf32>
    %c2_95 = arith.constant 2 : index
    %c0_96 = arith.constant 0 : index
    %c0_97 = arith.constant 0 : index
    %104 = vector.load %arg2[%c2_95, %c0_96, %c0_97] : memref<5x16x1xf32, #tpu.memory_space<vmem>>, vector<1x16x1xf32>
    %105 = vector.shape_cast %104 : vector<1x16x1xf32> to vector<16x1xf32>
    %106 = vector.broadcast %105 : vector<16x1xf32> to vector<16x16xf32>
    %107 = arith.mulf %106, %103 : vector<16x16xf32>
    %108 = arith.addf %72, %107 : vector<16x16xf32>
    %cst_98 = arith.constant 0.000000e+00 : f32
    %109 = vector.broadcast %cst_98 : f32 to vector<16x16xf32>
    %c0_99 = arith.constant 0 : index
    %c3_100 = arith.constant 3 : index
    %c0_101 = arith.constant 0 : index
    %110 = vector.load %arg1[%c0_99, %c3_100, %c0_101] : memref<1x28x16xbf16, #tpu.memory_space<vmem>>, vector<1x16x16xbf16>
    %111 = vector.shape_cast %110 : vector<1x16x16xbf16> to vector<16x16xbf16>
    %c3_102 = arith.constant 3 : index
    %c0_103 = arith.constant 0 : index
    %c0_104 = arith.constant 0 : index
    %112 = vector.load %arg3[%c3_102, %c0_103, %c0_104] : memref<25x16x16xbf16, #tpu.memory_space<vmem>>, vector<1x16x16xbf16>
    %113 = vector.shape_cast %112 : vector<1x16x16xbf16> to vector<16x16xbf16>
    %cst_105 = arith.constant dense<0.000000e+00> : vector<16x16xf32>
    %114 = tpu.matmul %111, %113, %cst_105 {dimension_numbers = #tpu.dot_dimension_numbers<[1], [0], [0], [1], [0, 0, 1, 1], [], []>} : vector<16x16xbf16>, vector<16x16xbf16>, vector<16x16xf32> -> vector<16x16xf32>
    %115 = arith.addf %109, %114 : vector<16x16xf32>
    %c0_106 = arith.constant 0 : index
    %c5_107 = arith.constant 5 : index
    %c0_108 = arith.constant 0 : index
    %116 = vector.load %arg1[%c0_106, %c5_107, %c0_108] : memref<1x28x16xbf16, #tpu.memory_space<vmem>>, vector<1x16x16xbf16>
    %117 = vector.shape_cast %116 : vector<1x16x16xbf16> to vector<16x16xbf16>
    %c8_109 = arith.constant 8 : index
    %c0_110 = arith.constant 0 : index
    %c0_111 = arith.constant 0 : index
    %118 = vector.load %arg3[%c8_109, %c0_110, %c0_111] : memref<25x16x16xbf16, #tpu.memory_space<vmem>>, vector<1x16x16xbf16>
    %119 = vector.shape_cast %118 : vector<1x16x16xbf16> to vector<16x16xbf16>
    %cst_112 = arith.constant dense<0.000000e+00> : vector<16x16xf32>
    %120 = tpu.matmul %117, %119, %cst_112 {dimension_numbers = #tpu.dot_dimension_numbers<[1], [0], [0], [1], [0, 0, 1, 1], [], []>} : vector<16x16xbf16>, vector<16x16xbf16>, vector<16x16xf32> -> vector<16x16xf32>
    %121 = arith.addf %115, %120 : vector<16x16xf32>
    %c0_113 = arith.constant 0 : index
    %c7_114 = arith.constant 7 : index
    %c0_115 = arith.constant 0 : index
    %122 = vector.load %arg1[%c0_113, %c7_114, %c0_115] : memref<1x28x16xbf16, #tpu.memory_space<vmem>>, vector<1x16x16xbf16>
    %123 = vector.shape_cast %122 : vector<1x16x16xbf16> to vector<16x16xbf16>
    %c13 = arith.constant 13 : index
    %c0_116 = arith.constant 0 : index
    %c0_117 = arith.constant 0 : index
    %124 = vector.load %arg3[%c13, %c0_116, %c0_117] : memref<25x16x16xbf16, #tpu.memory_space<vmem>>, vector<1x16x16xbf16>
    %125 = vector.shape_cast %124 : vector<1x16x16xbf16> to vector<16x16xbf16>
    %cst_118 = arith.constant dense<0.000000e+00> : vector<16x16xf32>
    %126 = tpu.matmul %123, %125, %cst_118 {dimension_numbers = #tpu.dot_dimension_numbers<[1], [0], [0], [1], [0, 0, 1, 1], [], []>} : vector<16x16xbf16>, vector<16x16xbf16>, vector<16x16xf32> -> vector<16x16xf32>
    %127 = arith.addf %121, %126 : vector<16x16xf32>
    %c0_119 = arith.constant 0 : index
    %c9_120 = arith.constant 9 : index
    %c0_121 = arith.constant 0 : index
    %128 = vector.load %arg1[%c0_119, %c9_120, %c0_121] : memref<1x28x16xbf16, #tpu.memory_space<vmem>>, vector<1x16x16xbf16>
    %129 = vector.shape_cast %128 : vector<1x16x16xbf16> to vector<16x16xbf16>
    %c18 = arith.constant 18 : index
    %c0_122 = arith.constant 0 : index
    %c0_123 = arith.constant 0 : index
    %130 = vector.load %arg3[%c18, %c0_122, %c0_123] : memref<25x16x16xbf16, #tpu.memory_space<vmem>>, vector<1x16x16xbf16>
    %131 = vector.shape_cast %130 : vector<1x16x16xbf16> to vector<16x16xbf16>
    %cst_124 = arith.constant dense<0.000000e+00> : vector<16x16xf32>
    %132 = tpu.matmul %129, %131, %cst_124 {dimension_numbers = #tpu.dot_dimension_numbers<[1], [0], [0], [1], [0, 0, 1, 1], [], []>} : vector<16x16xbf16>, vector<16x16xbf16>, vector<16x16xf32> -> vector<16x16xf32>
    %133 = arith.addf %127, %132 : vector<16x16xf32>
    %c0_125 = arith.constant 0 : index
    %c11_126 = arith.constant 11 : index
    %c0_127 = arith.constant 0 : index
    %134 = vector.load %arg1[%c0_125, %c11_126, %c0_127] : memref<1x28x16xbf16, #tpu.memory_space<vmem>>, vector<1x16x16xbf16>
    %135 = vector.shape_cast %134 : vector<1x16x16xbf16> to vector<16x16xbf16>
    %c23 = arith.constant 23 : index
    %c0_128 = arith.constant 0 : index
    %c0_129 = arith.constant 0 : index
    %136 = vector.load %arg3[%c23, %c0_128, %c0_129] : memref<25x16x16xbf16, #tpu.memory_space<vmem>>, vector<1x16x16xbf16>
    %137 = vector.shape_cast %136 : vector<1x16x16xbf16> to vector<16x16xbf16>
    %cst_130 = arith.constant dense<0.000000e+00> : vector<16x16xf32>
    %138 = tpu.matmul %135, %137, %cst_130 {dimension_numbers = #tpu.dot_dimension_numbers<[1], [0], [0], [1], [0, 0, 1, 1], [], []>} : vector<16x16xbf16>, vector<16x16xbf16>, vector<16x16xf32> -> vector<16x16xf32>
    %139 = arith.addf %133, %138 : vector<16x16xf32>
    %c3_131 = arith.constant 3 : index
    %c0_132 = arith.constant 0 : index
    %c0_133 = arith.constant 0 : index
    %140 = vector.load %arg2[%c3_131, %c0_132, %c0_133] : memref<5x16x1xf32, #tpu.memory_space<vmem>>, vector<1x16x1xf32>
    %141 = vector.shape_cast %140 : vector<1x16x1xf32> to vector<16x1xf32>
    %142 = vector.broadcast %141 : vector<16x1xf32> to vector<16x16xf32>
    %143 = arith.mulf %142, %139 : vector<16x16xf32>
    %144 = arith.addf %108, %143 : vector<16x16xf32>
    %cst_134 = arith.constant 0.000000e+00 : f32
    %145 = vector.broadcast %cst_134 : f32 to vector<16x16xf32>
    %c0_135 = arith.constant 0 : index
    %c4_136 = arith.constant 4 : index
    %c0_137 = arith.constant 0 : index
    %146 = vector.load %arg1[%c0_135, %c4_136, %c0_137] : memref<1x28x16xbf16, #tpu.memory_space<vmem>>, vector<1x16x16xbf16>
    %147 = vector.shape_cast %146 : vector<1x16x16xbf16> to vector<16x16xbf16>
    %c4_138 = arith.constant 4 : index
    %c0_139 = arith.constant 0 : index
    %c0_140 = arith.constant 0 : index
    %148 = vector.load %arg3[%c4_138, %c0_139, %c0_140] : memref<25x16x16xbf16, #tpu.memory_space<vmem>>, vector<1x16x16xbf16>
    %149 = vector.shape_cast %148 : vector<1x16x16xbf16> to vector<16x16xbf16>
    %cst_141 = arith.constant dense<0.000000e+00> : vector<16x16xf32>
    %150 = tpu.matmul %147, %149, %cst_141 {dimension_numbers = #tpu.dot_dimension_numbers<[1], [0], [0], [1], [0, 0, 1, 1], [], []>} : vector<16x16xbf16>, vector<16x16xbf16>, vector<16x16xf32> -> vector<16x16xf32>
    %151 = arith.addf %145, %150 : vector<16x16xf32>
    %c0_142 = arith.constant 0 : index
    %c6_143 = arith.constant 6 : index
    %c0_144 = arith.constant 0 : index
    %152 = vector.load %arg1[%c0_142, %c6_143, %c0_144] : memref<1x28x16xbf16, #tpu.memory_space<vmem>>, vector<1x16x16xbf16>
    %153 = vector.shape_cast %152 : vector<1x16x16xbf16> to vector<16x16xbf16>
    %c9_145 = arith.constant 9 : index
    %c0_146 = arith.constant 0 : index
    %c0_147 = arith.constant 0 : index
    %154 = vector.load %arg3[%c9_145, %c0_146, %c0_147] : memref<25x16x16xbf16, #tpu.memory_space<vmem>>, vector<1x16x16xbf16>
    %155 = vector.shape_cast %154 : vector<1x16x16xbf16> to vector<16x16xbf16>
    %cst_148 = arith.constant dense<0.000000e+00> : vector<16x16xf32>
    %156 = tpu.matmul %153, %155, %cst_148 {dimension_numbers = #tpu.dot_dimension_numbers<[1], [0], [0], [1], [0, 0, 1, 1], [], []>} : vector<16x16xbf16>, vector<16x16xbf16>, vector<16x16xf32> -> vector<16x16xf32>
    %157 = arith.addf %151, %156 : vector<16x16xf32>
    %c0_149 = arith.constant 0 : index
    %c8_150 = arith.constant 8 : index
    %c0_151 = arith.constant 0 : index
    %158 = vector.load %arg1[%c0_149, %c8_150, %c0_151] : memref<1x28x16xbf16, #tpu.memory_space<vmem>>, vector<1x16x16xbf16>
    %159 = vector.shape_cast %158 : vector<1x16x16xbf16> to vector<16x16xbf16>
    %c14 = arith.constant 14 : index
    %c0_152 = arith.constant 0 : index
    %c0_153 = arith.constant 0 : index
    %160 = vector.load %arg3[%c14, %c0_152, %c0_153] : memref<25x16x16xbf16, #tpu.memory_space<vmem>>, vector<1x16x16xbf16>
    %161 = vector.shape_cast %160 : vector<1x16x16xbf16> to vector<16x16xbf16>
    %cst_154 = arith.constant dense<0.000000e+00> : vector<16x16xf32>
    %162 = tpu.matmul %159, %161, %cst_154 {dimension_numbers = #tpu.dot_dimension_numbers<[1], [0], [0], [1], [0, 0, 1, 1], [], []>} : vector<16x16xbf16>, vector<16x16xbf16>, vector<16x16xf32> -> vector<16x16xf32>
    %163 = arith.addf %157, %162 : vector<16x16xf32>
    %c0_155 = arith.constant 0 : index
    %c10_156 = arith.constant 10 : index
    %c0_157 = arith.constant 0 : index
    %164 = vector.load %arg1[%c0_155, %c10_156, %c0_157] : memref<1x28x16xbf16, #tpu.memory_space<vmem>>, vector<1x16x16xbf16>
    %165 = vector.shape_cast %164 : vector<1x16x16xbf16> to vector<16x16xbf16>
    %c19 = arith.constant 19 : index
    %c0_158 = arith.constant 0 : index
    %c0_159 = arith.constant 0 : index
    %166 = vector.load %arg3[%c19, %c0_158, %c0_159] : memref<25x16x16xbf16, #tpu.memory_space<vmem>>, vector<1x16x16xbf16>
    %167 = vector.shape_cast %166 : vector<1x16x16xbf16> to vector<16x16xbf16>
    %cst_160 = arith.constant dense<0.000000e+00> : vector<16x16xf32>
    %168 = tpu.matmul %165, %167, %cst_160 {dimension_numbers = #tpu.dot_dimension_numbers<[1], [0], [0], [1], [0, 0, 1, 1], [], []>} : vector<16x16xbf16>, vector<16x16xbf16>, vector<16x16xf32> -> vector<16x16xf32>
    %169 = arith.addf %163, %168 : vector<16x16xf32>
    %c0_161 = arith.constant 0 : index
    %c12_162 = arith.constant 12 : index
    %c0_163 = arith.constant 0 : index
    %170 = vector.load %arg1[%c0_161, %c12_162, %c0_163] : memref<1x28x16xbf16, #tpu.memory_space<vmem>>, vector<1x16x16xbf16>
    %171 = vector.shape_cast %170 : vector<1x16x16xbf16> to vector<16x16xbf16>
    %c24 = arith.constant 24 : index
    %c0_164 = arith.constant 0 : index
    %c0_165 = arith.constant 0 : index
    %172 = vector.load %arg3[%c24, %c0_164, %c0_165] : memref<25x16x16xbf16, #tpu.memory_space<vmem>>, vector<1x16x16xbf16>
    %173 = vector.shape_cast %172 : vector<1x16x16xbf16> to vector<16x16xbf16>
    %cst_166 = arith.constant dense<0.000000e+00> : vector<16x16xf32>
    %174 = tpu.matmul %171, %173, %cst_166 {dimension_numbers = #tpu.dot_dimension_numbers<[1], [0], [0], [1], [0, 0, 1, 1], [], []>} : vector<16x16xbf16>, vector<16x16xbf16>, vector<16x16xf32> -> vector<16x16xf32>
    %175 = arith.addf %169, %174 : vector<16x16xf32>
    %c4_167 = arith.constant 4 : index
    %c0_168 = arith.constant 0 : index
    %c0_169 = arith.constant 0 : index
    %176 = vector.load %arg2[%c4_167, %c0_168, %c0_169] : memref<5x16x1xf32, #tpu.memory_space<vmem>>, vector<1x16x1xf32>
    %177 = vector.shape_cast %176 : vector<1x16x1xf32> to vector<16x1xf32>
    %178 = vector.broadcast %177 : vector<16x1xf32> to vector<16x16xf32>
    %179 = arith.mulf %178, %175 : vector<16x16xf32>
    %180 = arith.addf %144, %179 : vector<16x16xf32>
    %c0_170 = arith.constant 0 : index
    %c0_171 = arith.constant 0 : index
    %181 = vector.load %arg4[%c0_170, %c0_171] : memref<1x16xf32, #tpu.memory_space<vmem>>, vector<1x16xf32>
    %182 = vector.broadcast %181 : vector<1x16xf32> to vector<16x16xf32>
    %183 = arith.addf %180, %182 : vector<16x16xf32>
    %cst_172 = arith.constant 5.000000e-01 : f32
    %184 = vector.broadcast %cst_172 : f32 to vector<16x16xf32>
    %185 = arith.mulf %184, %183 : vector<16x16xf32>
    %cst_173 = arith.constant 0.707106769 : f32
    %186 = vector.broadcast %cst_173 : f32 to vector<16x16xf32>
    %187 = arith.mulf %183, %186 : vector<16x16xf32>
    %188 = math.absf %187 : vector<16x16xf32>
    %cst_174 = arith.constant 0.327591091 : f32
    %189 = vector.broadcast %cst_174 : f32 to vector<16x16xf32>
    %190 = arith.mulf %189, %188 : vector<16x16xf32>
    %cst_175 = arith.constant 1.000000e+00 : f32
    %191 = vector.broadcast %cst_175 : f32 to vector<16x16xf32>
    %192 = arith.addf %191, %190 : vector<16x16xf32>
    %cst_176 = arith.constant 1.000000e+00 : f32
    %193 = vector.broadcast %cst_176 : f32 to vector<16x16xf32>
    %194 = arith.divf %193, %192 : vector<16x16xf32>
    %cst_177 = arith.constant 1.06140542 : f32
    %195 = vector.broadcast %cst_177 : f32 to vector<16x16xf32>
    %196 = arith.mulf %195, %194 : vector<16x16xf32>
    %cst_178 = arith.constant -1.45315206 : f32
    %197 = vector.broadcast %cst_178 : f32 to vector<16x16xf32>
    %198 = arith.addf %196, %197 : vector<16x16xf32>
    %199 = arith.mulf %198, %194 : vector<16x16xf32>
    %cst_179 = arith.constant 1.42141378 : f32
    %200 = vector.broadcast %cst_179 : f32 to vector<16x16xf32>
    %201 = arith.addf %199, %200 : vector<16x16xf32>
    %202 = arith.mulf %201, %194 : vector<16x16xf32>
    %cst_180 = arith.constant -0.284496725 : f32
    %203 = vector.broadcast %cst_180 : f32 to vector<16x16xf32>
    %204 = arith.addf %202, %203 : vector<16x16xf32>
    %205 = arith.mulf %204, %194 : vector<16x16xf32>
    %cst_181 = arith.constant 0.254829586 : f32
    %206 = vector.broadcast %cst_181 : f32 to vector<16x16xf32>
    %207 = arith.addf %205, %206 : vector<16x16xf32>
    %208 = arith.mulf %207, %194 : vector<16x16xf32>
    %cst_182 = arith.constant 0.000000e+00 : f32
    %209 = vector.broadcast %cst_182 : f32 to vector<16x16xf32>
    %210 = arith.subf %209, %188 : vector<16x16xf32>
    %211 = arith.mulf %210, %188 : vector<16x16xf32>
    %212 = math.exp %211 : vector<16x16xf32>
    %213 = arith.mulf %208, %212 : vector<16x16xf32>
    %cst_183 = arith.constant 1.000000e+00 : f32
    %214 = vector.broadcast %cst_183 : f32 to vector<16x16xf32>
    %215 = arith.subf %214, %213 : vector<16x16xf32>
    %cst_184 = arith.constant 0.000000e+00 : f32
    %216 = vector.broadcast %cst_184 : f32 to vector<16x16xf32>
    %217 = arith.cmpf oge, %187, %216 : vector<16x16xf32>
    %cst_185 = arith.constant 0.000000e+00 : f32
    %218 = vector.broadcast %cst_185 : f32 to vector<16x16xf32>
    %219 = arith.subf %218, %215 : vector<16x16xf32>
    %220 = arith.select %217, %215, %219 : vector<16x16xi1>, vector<16x16xf32>
    %cst_186 = arith.constant 1.000000e+00 : f32
    %221 = vector.broadcast %cst_186 : f32 to vector<16x16xf32>
    %222 = arith.addf %221, %220 : vector<16x16xf32>
    %223 = arith.mulf %185, %222 : vector<16x16xf32>
    %cst_187 = arith.constant 0.000000e+00 : bf16
    %224 = vector.broadcast %cst_187 : bf16 to vector<28x16xbf16>
    %c0_188 = arith.constant 0 : index
    %c0_189 = arith.constant 0 : index
    %225 = vector.load %arg8[%c0_188, %c0_189] : memref<28x16xbf16, #tpu.memory_space<vmem>>, vector<28x16xbf16>
    tpu.vector_store %arg8[%c0_188, %c0_189], %224 {strides = array<i32>} : memref<28x16xbf16, #tpu.memory_space<vmem>>, vector<28x16xbf16>,
    %226 = arith.truncf %223 : vector<16x16xf32> to vector<16x16xbf16>
    %c6_190 = arith.constant 6 : index
    %c0_191 = arith.constant 0 : index
    %227 = vector.load %arg8[%c6_190, %c0_191] : memref<28x16xbf16, #tpu.memory_space<vmem>>, vector<16x16xbf16>
    tpu.vector_store %arg8[%c6_190, %c0_191], %226 {strides = array<i32>} : memref<28x16xbf16, #tpu.memory_space<vmem>>, vector<16x16xbf16>,
    %cst_192 = arith.constant 0.000000e+00 : f32
    %228 = vector.broadcast %cst_192 : f32 to vector<16x16xf32>
    %cst_193 = arith.constant 0.000000e+00 : f32
    %229 = vector.broadcast %cst_193 : f32 to vector<16x16xf32>
    %c0_194 = arith.constant 0 : index
    %c0_195 = arith.constant 0 : index
    %230 = vector.load %arg8[%c0_194, %c0_195] : memref<28x16xbf16, #tpu.memory_space<vmem>>, vector<16x16xbf16>
    %c0_196 = arith.constant 0 : index
    %c0_197 = arith.constant 0 : index
    %c0_198 = arith.constant 0 : index
    %231 = vector.load %arg5[%c0_196, %c0_197, %c0_198] : memref<25x16x16xbf16, #tpu.memory_space<vmem>>, vector<1x16x16xbf16>
    %232 = vector.shape_cast %231 : vector<1x16x16xbf16> to vector<16x16xbf16>
    %cst_199 = arith.constant dense<0.000000e+00> : vector<16x16xf32>
    %233 = tpu.matmul %230, %232, %cst_199 {dimension_numbers = #tpu.dot_dimension_numbers<[1], [0], [0], [1], [0, 0, 1, 1], [], []>} : vector<16x16xbf16>, vector<16x16xbf16>, vector<16x16xf32> -> vector<16x16xf32>
    %234 = arith.addf %229, %233 : vector<16x16xf32>
    %c2_200 = arith.constant 2 : index
    %c0_201 = arith.constant 0 : index
    %235 = vector.load %arg8[%c2_200, %c0_201] : memref<28x16xbf16, #tpu.memory_space<vmem>>, vector<16x16xbf16>
    %c5_202 = arith.constant 5 : index
    %c0_203 = arith.constant 0 : index
    %c0_204 = arith.constant 0 : index
    %236 = vector.load %arg5[%c5_202, %c0_203, %c0_204] : memref<25x16x16xbf16, #tpu.memory_space<vmem>>, vector<1x16x16xbf16>
    %237 = vector.shape_cast %236 : vector<1x16x16xbf16> to vector<16x16xbf16>
    %cst_205 = arith.constant dense<0.000000e+00> : vector<16x16xf32>
    %238 = tpu.matmul %235, %237, %cst_205 {dimension_numbers = #tpu.dot_dimension_numbers<[1], [0], [0], [1], [0, 0, 1, 1], [], []>} : vector<16x16xbf16>, vector<16x16xbf16>, vector<16x16xf32> -> vector<16x16xf32>
    %239 = arith.addf %234, %238 : vector<16x16xf32>
    %c4_206 = arith.constant 4 : index
    %c0_207 = arith.constant 0 : index
    %240 = vector.load %arg8[%c4_206, %c0_207] : memref<28x16xbf16, #tpu.memory_space<vmem>>, vector<16x16xbf16>
    %c10_208 = arith.constant 10 : index
    %c0_209 = arith.constant 0 : index
    %c0_210 = arith.constant 0 : index
    %241 = vector.load %arg5[%c10_208, %c0_209, %c0_210] : memref<25x16x16xbf16, #tpu.memory_space<vmem>>, vector<1x16x16xbf16>
    %242 = vector.shape_cast %241 : vector<1x16x16xbf16> to vector<16x16xbf16>
    %cst_211 = arith.constant dense<0.000000e+00> : vector<16x16xf32>
    %243 = tpu.matmul %240, %242, %cst_211 {dimension_numbers = #tpu.dot_dimension_numbers<[1], [0], [0], [1], [0, 0, 1, 1], [], []>} : vector<16x16xbf16>, vector<16x16xbf16>, vector<16x16xf32> -> vector<16x16xf32>
    %244 = arith.addf %239, %243 : vector<16x16xf32>
    %c6_212 = arith.constant 6 : index
    %c0_213 = arith.constant 0 : index
    %245 = vector.load %arg8[%c6_212, %c0_213] : memref<28x16xbf16, #tpu.memory_space<vmem>>, vector<16x16xbf16>
    %c15_214 = arith.constant 15 : index
    %c0_215 = arith.constant 0 : index
    %c0_216 = arith.constant 0 : index
    %246 = vector.load %arg5[%c15_214, %c0_215, %c0_216] : memref<25x16x16xbf16, #tpu.memory_space<vmem>>, vector<1x16x16xbf16>
    %247 = vector.shape_cast %246 : vector<1x16x16xbf16> to vector<16x16xbf16>
    %cst_217 = arith.constant dense<0.000000e+00> : vector<16x16xf32>
    %248 = tpu.matmul %245, %247, %cst_217 {dimension_numbers = #tpu.dot_dimension_numbers<[1], [0], [0], [1], [0, 0, 1, 1], [], []>} : vector<16x16xbf16>, vector<16x16xbf16>, vector<16x16xf32> -> vector<16x16xf32>
    %249 = arith.addf %244, %248 : vector<16x16xf32>
    %c8_218 = arith.constant 8 : index
    %c0_219 = arith.constant 0 : index
    %250 = vector.load %arg8[%c8_218, %c0_219] : memref<28x16xbf16, #tpu.memory_space<vmem>>, vector<16x16xbf16>
    %c20_220 = arith.constant 20 : index
    %c0_221 = arith.constant 0 : index
    %c0_222 = arith.constant 0 : index
    %251 = vector.load %arg5[%c20_220, %c0_221, %c0_222] : memref<25x16x16xbf16, #tpu.memory_space<vmem>>, vector<1x16x16xbf16>
    %252 = vector.shape_cast %251 : vector<1x16x16xbf16> to vector<16x16xbf16>
    %cst_223 = arith.constant dense<0.000000e+00> : vector<16x16xf32>
    %253 = tpu.matmul %250, %252, %cst_223 {dimension_numbers = #tpu.dot_dimension_numbers<[1], [0], [0], [1], [0, 0, 1, 1], [], []>} : vector<16x16xbf16>, vector<16x16xbf16>, vector<16x16xf32> -> vector<16x16xf32>
    %254 = arith.addf %249, %253 : vector<16x16xf32>
    %c0_224 = arith.constant 0 : index
    %c0_225 = arith.constant 0 : index
    %c0_226 = arith.constant 0 : index
    %255 = vector.load %arg2[%c0_224, %c0_225, %c0_226] : memref<5x16x1xf32, #tpu.memory_space<vmem>>, vector<1x16x1xf32>
    %256 = vector.shape_cast %255 : vector<1x16x1xf32> to vector<16x1xf32>
    %257 = vector.broadcast %256 : vector<16x1xf32> to vector<16x16xf32>
    %258 = arith.mulf %257, %254 : vector<16x16xf32>
    %259 = arith.addf %228, %258 : vector<16x16xf32>
    %cst_227 = arith.constant 0.000000e+00 : f32
    %260 = vector.broadcast %cst_227 : f32 to vector<16x16xf32>
    %c1_228 = arith.constant 1 : index
    %c0_229 = arith.constant 0 : index
    %261 = vector.load %arg8[%c1_228, %c0_229] : memref<28x16xbf16, #tpu.memory_space<vmem>>, vector<16x16xbf16>
    %c1_230 = arith.constant 1 : index
    %c0_231 = arith.constant 0 : index
    %c0_232 = arith.constant 0 : index
    %262 = vector.load %arg5[%c1_230, %c0_231, %c0_232] : memref<25x16x16xbf16, #tpu.memory_space<vmem>>, vector<1x16x16xbf16>
    %263 = vector.shape_cast %262 : vector<1x16x16xbf16> to vector<16x16xbf16>
    %cst_233 = arith.constant dense<0.000000e+00> : vector<16x16xf32>
    %264 = tpu.matmul %261, %263, %cst_233 {dimension_numbers = #tpu.dot_dimension_numbers<[1], [0], [0], [1], [0, 0, 1, 1], [], []>} : vector<16x16xbf16>, vector<16x16xbf16>, vector<16x16xf32> -> vector<16x16xf32>
    %265 = arith.addf %260, %264 : vector<16x16xf32>
    %c3_234 = arith.constant 3 : index
    %c0_235 = arith.constant 0 : index
    %266 = vector.load %arg8[%c3_234, %c0_235] : memref<28x16xbf16, #tpu.memory_space<vmem>>, vector<16x16xbf16>
    %c6_236 = arith.constant 6 : index
    %c0_237 = arith.constant 0 : index
    %c0_238 = arith.constant 0 : index
    %267 = vector.load %arg5[%c6_236, %c0_237, %c0_238] : memref<25x16x16xbf16, #tpu.memory_space<vmem>>, vector<1x16x16xbf16>
    %268 = vector.shape_cast %267 : vector<1x16x16xbf16> to vector<16x16xbf16>
    %cst_239 = arith.constant dense<0.000000e+00> : vector<16x16xf32>
    %269 = tpu.matmul %266, %268, %cst_239 {dimension_numbers = #tpu.dot_dimension_numbers<[1], [0], [0], [1], [0, 0, 1, 1], [], []>} : vector<16x16xbf16>, vector<16x16xbf16>, vector<16x16xf32> -> vector<16x16xf32>
    %270 = arith.addf %265, %269 : vector<16x16xf32>
    %c5_240 = arith.constant 5 : index
    %c0_241 = arith.constant 0 : index
    %271 = vector.load %arg8[%c5_240, %c0_241] : memref<28x16xbf16, #tpu.memory_space<vmem>>, vector<16x16xbf16>
    %c11_242 = arith.constant 11 : index
    %c0_243 = arith.constant 0 : index
    %c0_244 = arith.constant 0 : index
    %272 = vector.load %arg5[%c11_242, %c0_243, %c0_244] : memref<25x16x16xbf16, #tpu.memory_space<vmem>>, vector<1x16x16xbf16>
    %273 = vector.shape_cast %272 : vector<1x16x16xbf16> to vector<16x16xbf16>
    %cst_245 = arith.constant dense<0.000000e+00> : vector<16x16xf32>
    %274 = tpu.matmul %271, %273, %cst_245 {dimension_numbers = #tpu.dot_dimension_numbers<[1], [0], [0], [1], [0, 0, 1, 1], [], []>} : vector<16x16xbf16>, vector<16x16xbf16>, vector<16x16xf32> -> vector<16x16xf32>
    %275 = arith.addf %270, %274 : vector<16x16xf32>
    %c7_246 = arith.constant 7 : index
    %c0_247 = arith.constant 0 : index
    %276 = vector.load %arg8[%c7_246, %c0_247] : memref<28x16xbf16, #tpu.memory_space<vmem>>, vector<16x16xbf16>
    %c16_248 = arith.constant 16 : index
    %c0_249 = arith.constant 0 : index
    %c0_250 = arith.constant 0 : index
    %277 = vector.load %arg5[%c16_248, %c0_249, %c0_250] : memref<25x16x16xbf16, #tpu.memory_space<vmem>>, vector<1x16x16xbf16>
    %278 = vector.shape_cast %277 : vector<1x16x16xbf16> to vector<16x16xbf16>
    %cst_251 = arith.constant dense<0.000000e+00> : vector<16x16xf32>
    %279 = tpu.matmul %276, %278, %cst_251 {dimension_numbers = #tpu.dot_dimension_numbers<[1], [0], [0], [1], [0, 0, 1, 1], [], []>} : vector<16x16xbf16>, vector<16x16xbf16>, vector<16x16xf32> -> vector<16x16xf32>
    %280 = arith.addf %275, %279 : vector<16x16xf32>
    %c9_252 = arith.constant 9 : index
    %c0_253 = arith.constant 0 : index
    %281 = vector.load %arg8[%c9_252, %c0_253] : memref<28x16xbf16, #tpu.memory_space<vmem>>, vector<16x16xbf16>
    %c21_254 = arith.constant 21 : index
    %c0_255 = arith.constant 0 : index
    %c0_256 = arith.constant 0 : index
    %282 = vector.load %arg5[%c21_254, %c0_255, %c0_256] : memref<25x16x16xbf16, #tpu.memory_space<vmem>>, vector<1x16x16xbf16>
    %283 = vector.shape_cast %282 : vector<1x16x16xbf16> to vector<16x16xbf16>
    %cst_257 = arith.constant dense<0.000000e+00> : vector<16x16xf32>
    %284 = tpu.matmul %281, %283, %cst_257 {dimension_numbers = #tpu.dot_dimension_numbers<[1], [0], [0], [1], [0, 0, 1, 1], [], []>} : vector<16x16xbf16>, vector<16x16xbf16>, vector<16x16xf32> -> vector<16x16xf32>
    %285 = arith.addf %280, %284 : vector<16x16xf32>
    %c1_258 = arith.constant 1 : index
    %c0_259 = arith.constant 0 : index
    %c0_260 = arith.constant 0 : index
    %286 = vector.load %arg2[%c1_258, %c0_259, %c0_260] : memref<5x16x1xf32, #tpu.memory_space<vmem>>, vector<1x16x1xf32>
    %287 = vector.shape_cast %286 : vector<1x16x1xf32> to vector<16x1xf32>
    %288 = vector.broadcast %287 : vector<16x1xf32> to vector<16x16xf32>
    %289 = arith.mulf %288, %285 : vector<16x16xf32>
    %290 = arith.addf %259, %289 : vector<16x16xf32>
    %cst_261 = arith.constant 0.000000e+00 : f32
    %291 = vector.broadcast %cst_261 : f32 to vector<16x16xf32>
    %c2_262 = arith.constant 2 : index
    %c0_263 = arith.constant 0 : index
    %292 = vector.load %arg8[%c2_262, %c0_263] : memref<28x16xbf16, #tpu.memory_space<vmem>>, vector<16x16xbf16>
    %c2_264 = arith.constant 2 : index
    %c0_265 = arith.constant 0 : index
    %c0_266 = arith.constant 0 : index
    %293 = vector.load %arg5[%c2_264, %c0_265, %c0_266] : memref<25x16x16xbf16, #tpu.memory_space<vmem>>, vector<1x16x16xbf16>
    %294 = vector.shape_cast %293 : vector<1x16x16xbf16> to vector<16x16xbf16>
    %cst_267 = arith.constant dense<0.000000e+00> : vector<16x16xf32>
    %295 = tpu.matmul %292, %294, %cst_267 {dimension_numbers = #tpu.dot_dimension_numbers<[1], [0], [0], [1], [0, 0, 1, 1], [], []>} : vector<16x16xbf16>, vector<16x16xbf16>, vector<16x16xf32> -> vector<16x16xf32>
    %296 = arith.addf %291, %295 : vector<16x16xf32>
    %c4_268 = arith.constant 4 : index
    %c0_269 = arith.constant 0 : index
    %297 = vector.load %arg8[%c4_268, %c0_269] : memref<28x16xbf16, #tpu.memory_space<vmem>>, vector<16x16xbf16>
    %c7_270 = arith.constant 7 : index
    %c0_271 = arith.constant 0 : index
    %c0_272 = arith.constant 0 : index
    %298 = vector.load %arg5[%c7_270, %c0_271, %c0_272] : memref<25x16x16xbf16, #tpu.memory_space<vmem>>, vector<1x16x16xbf16>
    %299 = vector.shape_cast %298 : vector<1x16x16xbf16> to vector<16x16xbf16>
    %cst_273 = arith.constant dense<0.000000e+00> : vector<16x16xf32>
    %300 = tpu.matmul %297, %299, %cst_273 {dimension_numbers = #tpu.dot_dimension_numbers<[1], [0], [0], [1], [0, 0, 1, 1], [], []>} : vector<16x16xbf16>, vector<16x16xbf16>, vector<16x16xf32> -> vector<16x16xf32>
    %301 = arith.addf %296, %300 : vector<16x16xf32>
    %c6_274 = arith.constant 6 : index
    %c0_275 = arith.constant 0 : index
    %302 = vector.load %arg8[%c6_274, %c0_275] : memref<28x16xbf16, #tpu.memory_space<vmem>>, vector<16x16xbf16>
    %c12_276 = arith.constant 12 : index
    %c0_277 = arith.constant 0 : index
    %c0_278 = arith.constant 0 : index
    %303 = vector.load %arg5[%c12_276, %c0_277, %c0_278] : memref<25x16x16xbf16, #tpu.memory_space<vmem>>, vector<1x16x16xbf16>
    %304 = vector.shape_cast %303 : vector<1x16x16xbf16> to vector<16x16xbf16>
    %cst_279 = arith.constant dense<0.000000e+00> : vector<16x16xf32>
    %305 = tpu.matmul %302, %304, %cst_279 {dimension_numbers = #tpu.dot_dimension_numbers<[1], [0], [0], [1], [0, 0, 1, 1], [], []>} : vector<16x16xbf16>, vector<16x16xbf16>, vector<16x16xf32> -> vector<16x16xf32>
    %306 = arith.addf %301, %305 : vector<16x16xf32>
    %c8_280 = arith.constant 8 : index
    %c0_281 = arith.constant 0 : index
    %307 = vector.load %arg8[%c8_280, %c0_281] : memref<28x16xbf16, #tpu.memory_space<vmem>>, vector<16x16xbf16>
    %c17_282 = arith.constant 17 : index
    %c0_283 = arith.constant 0 : index
    %c0_284 = arith.constant 0 : index
    %308 = vector.load %arg5[%c17_282, %c0_283, %c0_284] : memref<25x16x16xbf16, #tpu.memory_space<vmem>>, vector<1x16x16xbf16>
    %309 = vector.shape_cast %308 : vector<1x16x16xbf16> to vector<16x16xbf16>
    %cst_285 = arith.constant dense<0.000000e+00> : vector<16x16xf32>
    %310 = tpu.matmul %307, %309, %cst_285 {dimension_numbers = #tpu.dot_dimension_numbers<[1], [0], [0], [1], [0, 0, 1, 1], [], []>} : vector<16x16xbf16>, vector<16x16xbf16>, vector<16x16xf32> -> vector<16x16xf32>
    %311 = arith.addf %306, %310 : vector<16x16xf32>
    %c10_286 = arith.constant 10 : index
    %c0_287 = arith.constant 0 : index
    %312 = vector.load %arg8[%c10_286, %c0_287] : memref<28x16xbf16, #tpu.memory_space<vmem>>, vector<16x16xbf16>
    %c22_288 = arith.constant 22 : index
    %c0_289 = arith.constant 0 : index
    %c0_290 = arith.constant 0 : index
    %313 = vector.load %arg5[%c22_288, %c0_289, %c0_290] : memref<25x16x16xbf16, #tpu.memory_space<vmem>>, vector<1x16x16xbf16>
    %314 = vector.shape_cast %313 : vector<1x16x16xbf16> to vector<16x16xbf16>
    %cst_291 = arith.constant dense<0.000000e+00> : vector<16x16xf32>
    %315 = tpu.matmul %312, %314, %cst_291 {dimension_numbers = #tpu.dot_dimension_numbers<[1], [0], [0], [1], [0, 0, 1, 1], [], []>} : vector<16x16xbf16>, vector<16x16xbf16>, vector<16x16xf32> -> vector<16x16xf32>
    %316 = arith.addf %311, %315 : vector<16x16xf32>
    %c2_292 = arith.constant 2 : index
    %c0_293 = arith.constant 0 : index
    %c0_294 = arith.constant 0 : index
    %317 = vector.load %arg2[%c2_292, %c0_293, %c0_294] : memref<5x16x1xf32, #tpu.memory_space<vmem>>, vector<1x16x1xf32>
    %318 = vector.shape_cast %317 : vector<1x16x1xf32> to vector<16x1xf32>
    %319 = vector.broadcast %318 : vector<16x1xf32> to vector<16x16xf32>
    %320 = arith.mulf %319, %316 : vector<16x16xf32>
    %321 = arith.addf %290, %320 : vector<16x16xf32>
    %cst_295 = arith.constant 0.000000e+00 : f32
    %322 = vector.broadcast %cst_295 : f32 to vector<16x16xf32>
    %c3_296 = arith.constant 3 : index
    %c0_297 = arith.constant 0 : index
    %323 = vector.load %arg8[%c3_296, %c0_297] : memref<28x16xbf16, #tpu.memory_space<vmem>>, vector<16x16xbf16>
    %c3_298 = arith.constant 3 : index
    %c0_299 = arith.constant 0 : index
    %c0_300 = arith.constant 0 : index
    %324 = vector.load %arg5[%c3_298, %c0_299, %c0_300] : memref<25x16x16xbf16, #tpu.memory_space<vmem>>, vector<1x16x16xbf16>
    %325 = vector.shape_cast %324 : vector<1x16x16xbf16> to vector<16x16xbf16>
    %cst_301 = arith.constant dense<0.000000e+00> : vector<16x16xf32>
    %326 = tpu.matmul %323, %325, %cst_301 {dimension_numbers = #tpu.dot_dimension_numbers<[1], [0], [0], [1], [0, 0, 1, 1], [], []>} : vector<16x16xbf16>, vector<16x16xbf16>, vector<16x16xf32> -> vector<16x16xf32>
    %327 = arith.addf %322, %326 : vector<16x16xf32>
    %c5_302 = arith.constant 5 : index
    %c0_303 = arith.constant 0 : index
    %328 = vector.load %arg8[%c5_302, %c0_303] : memref<28x16xbf16, #tpu.memory_space<vmem>>, vector<16x16xbf16>
    %c8_304 = arith.constant 8 : index
    %c0_305 = arith.constant 0 : index
    %c0_306 = arith.constant 0 : index
    %329 = vector.load %arg5[%c8_304, %c0_305, %c0_306] : memref<25x16x16xbf16, #tpu.memory_space<vmem>>, vector<1x16x16xbf16>
    %330 = vector.shape_cast %329 : vector<1x16x16xbf16> to vector<16x16xbf16>
    %cst_307 = arith.constant dense<0.000000e+00> : vector<16x16xf32>
    %331 = tpu.matmul %328, %330, %cst_307 {dimension_numbers = #tpu.dot_dimension_numbers<[1], [0], [0], [1], [0, 0, 1, 1], [], []>} : vector<16x16xbf16>, vector<16x16xbf16>, vector<16x16xf32> -> vector<16x16xf32>
    %332 = arith.addf %327, %331 : vector<16x16xf32>
    %c7_308 = arith.constant 7 : index
    %c0_309 = arith.constant 0 : index
    %333 = vector.load %arg8[%c7_308, %c0_309] : memref<28x16xbf16, #tpu.memory_space<vmem>>, vector<16x16xbf16>
    %c13_310 = arith.constant 13 : index
    %c0_311 = arith.constant 0 : index
    %c0_312 = arith.constant 0 : index
    %334 = vector.load %arg5[%c13_310, %c0_311, %c0_312] : memref<25x16x16xbf16, #tpu.memory_space<vmem>>, vector<1x16x16xbf16>
    %335 = vector.shape_cast %334 : vector<1x16x16xbf16> to vector<16x16xbf16>
    %cst_313 = arith.constant dense<0.000000e+00> : vector<16x16xf32>
    %336 = tpu.matmul %333, %335, %cst_313 {dimension_numbers = #tpu.dot_dimension_numbers<[1], [0], [0], [1], [0, 0, 1, 1], [], []>} : vector<16x16xbf16>, vector<16x16xbf16>, vector<16x16xf32> -> vector<16x16xf32>
    %337 = arith.addf %332, %336 : vector<16x16xf32>
    %c9_314 = arith.constant 9 : index
    %c0_315 = arith.constant 0 : index
    %338 = vector.load %arg8[%c9_314, %c0_315] : memref<28x16xbf16, #tpu.memory_space<vmem>>, vector<16x16xbf16>
    %c18_316 = arith.constant 18 : index
    %c0_317 = arith.constant 0 : index
    %c0_318 = arith.constant 0 : index
    %339 = vector.load %arg5[%c18_316, %c0_317, %c0_318] : memref<25x16x16xbf16, #tpu.memory_space<vmem>>, vector<1x16x16xbf16>
    %340 = vector.shape_cast %339 : vector<1x16x16xbf16> to vector<16x16xbf16>
    %cst_319 = arith.constant dense<0.000000e+00> : vector<16x16xf32>
    %341 = tpu.matmul %338, %340, %cst_319 {dimension_numbers = #tpu.dot_dimension_numbers<[1], [0], [0], [1], [0, 0, 1, 1], [], []>} : vector<16x16xbf16>, vector<16x16xbf16>, vector<16x16xf32> -> vector<16x16xf32>
    %342 = arith.addf %337, %341 : vector<16x16xf32>
    %c11_320 = arith.constant 11 : index
    %c0_321 = arith.constant 0 : index
    %343 = vector.load %arg8[%c11_320, %c0_321] : memref<28x16xbf16, #tpu.memory_space<vmem>>, vector<16x16xbf16>
    %c23_322 = arith.constant 23 : index
    %c0_323 = arith.constant 0 : index
    %c0_324 = arith.constant 0 : index
    %344 = vector.load %arg5[%c23_322, %c0_323, %c0_324] : memref<25x16x16xbf16, #tpu.memory_space<vmem>>, vector<1x16x16xbf16>
    %345 = vector.shape_cast %344 : vector<1x16x16xbf16> to vector<16x16xbf16>
    %cst_325 = arith.constant dense<0.000000e+00> : vector<16x16xf32>
    %346 = tpu.matmul %343, %345, %cst_325 {dimension_numbers = #tpu.dot_dimension_numbers<[1], [0], [0], [1], [0, 0, 1, 1], [], []>} : vector<16x16xbf16>, vector<16x16xbf16>, vector<16x16xf32> -> vector<16x16xf32>
    %347 = arith.addf %342, %346 : vector<16x16xf32>
    %c3_326 = arith.constant 3 : index
    %c0_327 = arith.constant 0 : index
    %c0_328 = arith.constant 0 : index
    %348 = vector.load %arg2[%c3_326, %c0_327, %c0_328] : memref<5x16x1xf32, #tpu.memory_space<vmem>>, vector<1x16x1xf32>
    %349 = vector.shape_cast %348 : vector<1x16x1xf32> to vector<16x1xf32>
    %350 = vector.broadcast %349 : vector<16x1xf32> to vector<16x16xf32>
    %351 = arith.mulf %350, %347 : vector<16x16xf32>
    %352 = arith.addf %321, %351 : vector<16x16xf32>
    %cst_329 = arith.constant 0.000000e+00 : f32
    %353 = vector.broadcast %cst_329 : f32 to vector<16x16xf32>
    %c4_330 = arith.constant 4 : index
    %c0_331 = arith.constant 0 : index
    %354 = vector.load %arg8[%c4_330, %c0_331] : memref<28x16xbf16, #tpu.memory_space<vmem>>, vector<16x16xbf16>
    %c4_332 = arith.constant 4 : index
    %c0_333 = arith.constant 0 : index
    %c0_334 = arith.constant 0 : index
    %355 = vector.load %arg5[%c4_332, %c0_333, %c0_334] : memref<25x16x16xbf16, #tpu.memory_space<vmem>>, vector<1x16x16xbf16>
    %356 = vector.shape_cast %355 : vector<1x16x16xbf16> to vector<16x16xbf16>
    %cst_335 = arith.constant dense<0.000000e+00> : vector<16x16xf32>
    %357 = tpu.matmul %354, %356, %cst_335 {dimension_numbers = #tpu.dot_dimension_numbers<[1], [0], [0], [1], [0, 0, 1, 1], [], []>} : vector<16x16xbf16>, vector<16x16xbf16>, vector<16x16xf32> -> vector<16x16xf32>
    %358 = arith.addf %353, %357 : vector<16x16xf32>
    %c6_336 = arith.constant 6 : index
    %c0_337 = arith.constant 0 : index
    %359 = vector.load %arg8[%c6_336, %c0_337] : memref<28x16xbf16, #tpu.memory_space<vmem>>, vector<16x16xbf16>
    %c9_338 = arith.constant 9 : index
    %c0_339 = arith.constant 0 : index
    %c0_340 = arith.constant 0 : index
    %360 = vector.load %arg5[%c9_338, %c0_339, %c0_340] : memref<25x16x16xbf16, #tpu.memory_space<vmem>>, vector<1x16x16xbf16>
    %361 = vector.shape_cast %360 : vector<1x16x16xbf16> to vector<16x16xbf16>
    %cst_341 = arith.constant dense<0.000000e+00> : vector<16x16xf32>
    %362 = tpu.matmul %359, %361, %cst_341 {dimension_numbers = #tpu.dot_dimension_numbers<[1], [0], [0], [1], [0, 0, 1, 1], [], []>} : vector<16x16xbf16>, vector<16x16xbf16>, vector<16x16xf32> -> vector<16x16xf32>
    %363 = arith.addf %358, %362 : vector<16x16xf32>
    %c8_342 = arith.constant 8 : index
    %c0_343 = arith.constant 0 : index
    %364 = vector.load %arg8[%c8_342, %c0_343] : memref<28x16xbf16, #tpu.memory_space<vmem>>, vector<16x16xbf16>
    %c14_344 = arith.constant 14 : index
    %c0_345 = arith.constant 0 : index
    %c0_346 = arith.constant 0 : index
    %365 = vector.load %arg5[%c14_344, %c0_345, %c0_346] : memref<25x16x16xbf16, #tpu.memory_space<vmem>>, vector<1x16x16xbf16>
    %366 = vector.shape_cast %365 : vector<1x16x16xbf16> to vector<16x16xbf16>
    %cst_347 = arith.constant dense<0.000000e+00> : vector<16x16xf32>
    %367 = tpu.matmul %364, %366, %cst_347 {dimension_numbers = #tpu.dot_dimension_numbers<[1], [0], [0], [1], [0, 0, 1, 1], [], []>} : vector<16x16xbf16>, vector<16x16xbf16>, vector<16x16xf32> -> vector<16x16xf32>
    %368 = arith.addf %363, %367 : vector<16x16xf32>
    %c10_348 = arith.constant 10 : index
    %c0_349 = arith.constant 0 : index
    %369 = vector.load %arg8[%c10_348, %c0_349] : memref<28x16xbf16, #tpu.memory_space<vmem>>, vector<16x16xbf16>
    %c19_350 = arith.constant 19 : index
    %c0_351 = arith.constant 0 : index
    %c0_352 = arith.constant 0 : index
    %370 = vector.load %arg5[%c19_350, %c0_351, %c0_352] : memref<25x16x16xbf16, #tpu.memory_space<vmem>>, vector<1x16x16xbf16>
    %371 = vector.shape_cast %370 : vector<1x16x16xbf16> to vector<16x16xbf16>
    %cst_353 = arith.constant dense<0.000000e+00> : vector<16x16xf32>
    %372 = tpu.matmul %369, %371, %cst_353 {dimension_numbers = #tpu.dot_dimension_numbers<[1], [0], [0], [1], [0, 0, 1, 1], [], []>} : vector<16x16xbf16>, vector<16x16xbf16>, vector<16x16xf32> -> vector<16x16xf32>
    %373 = arith.addf %368, %372 : vector<16x16xf32>
    %c12_354 = arith.constant 12 : index
    %c0_355 = arith.constant 0 : index
    %374 = vector.load %arg8[%c12_354, %c0_355] : memref<28x16xbf16, #tpu.memory_space<vmem>>, vector<16x16xbf16>
    %c24_356 = arith.constant 24 : index
    %c0_357 = arith.constant 0 : index
    %c0_358 = arith.constant 0 : index
    %375 = vector.load %arg5[%c24_356, %c0_357, %c0_358] : memref<25x16x16xbf16, #tpu.memory_space<vmem>>, vector<1x16x16xbf16>
    %376 = vector.shape_cast %375 : vector<1x16x16xbf16> to vector<16x16xbf16>
    %cst_359 = arith.constant dense<0.000000e+00> : vector<16x16xf32>
    %377 = tpu.matmul %374, %376, %cst_359 {dimension_numbers = #tpu.dot_dimension_numbers<[1], [0], [0], [1], [0, 0, 1, 1], [], []>} : vector<16x16xbf16>, vector<16x16xbf16>, vector<16x16xf32> -> vector<16x16xf32>
    %378 = arith.addf %373, %377 : vector<16x16xf32>
    %c4_360 = arith.constant 4 : index
    %c0_361 = arith.constant 0 : index
    %c0_362 = arith.constant 0 : index
    %379 = vector.load %arg2[%c4_360, %c0_361, %c0_362] : memref<5x16x1xf32, #tpu.memory_space<vmem>>, vector<1x16x1xf32>
    %380 = vector.shape_cast %379 : vector<1x16x1xf32> to vector<16x1xf32>
    %381 = vector.broadcast %380 : vector<16x1xf32> to vector<16x16xf32>
    %382 = arith.mulf %381, %378 : vector<16x16xf32>
    %383 = arith.addf %352, %382 : vector<16x16xf32>
    %c0_363 = arith.constant 0 : index
    %c0_364 = arith.constant 0 : index
    %384 = vector.load %arg6[%c0_363, %c0_364] : memref<1x16xf32, #tpu.memory_space<vmem>>, vector<1x16xf32>
    %385 = vector.broadcast %384 : vector<1x16xf32> to vector<16x16xf32>
    %386 = arith.addf %383, %385 : vector<16x16xf32>
    %c0_365 = arith.constant 0 : index
    %c0_366 = arith.constant 0 : index
    %c0_367 = arith.constant 0 : index
    %387 = vector.load %arg7[%c0_365, %c0_366, %c0_367] : memref<1x16x16xf32, #tpu.memory_space<vmem>>, vector<1x16x16xf32>
    %388 = vector.shape_cast %387 : vector<1x16x16xf32> to vector<16x16xf32>
    %389 = vector.shape_cast %386 : vector<16x16xf32> to vector<1x16x16xf32>
    tpu.vector_store %arg7[%c0_365, %c0_366, %c0_367], %389 {strides = array<i32>} : memref<1x16x16xf32, #tpu.memory_space<vmem>>, vector<1x16x16xf32>,
    return
  }
  func.func @transform_0(%arg0: i32) -> (i32, i32, i32) {
    %c0_i32 = arith.constant 0 : i32
    %c0_i32_0 = arith.constant 0 : i32
    %c0_i32_1 = arith.constant 0 : i32
    return %arg0, %c0_i32, %c0_i32_0 : i32, i32, i32
  }
  func.func @transform_1(%arg0: i32) -> (i32, i32, i32) {
    %c0_i32 = arith.constant 0 : i32
    %c0_i32_0 = arith.constant 0 : i32
    %c0_i32_1 = arith.constant 0 : i32
    %c0_i32_2 = arith.constant 0 : i32
    return %c0_i32, %c0_i32_0, %c0_i32_1 : i32, i32, i32
  }
  func.func @transform_2(%arg0: i32) -> (i32, i32, i32) {
    %c0_i32 = arith.constant 0 : i32
    %c0_i32_0 = arith.constant 0 : i32
    %c0_i32_1 = arith.constant 0 : i32
    %c0_i32_2 = arith.constant 0 : i32
    return %c0_i32, %c0_i32_0, %c0_i32_1 : i32, i32, i32
  }
  func.func @transform_3(%arg0: i32) -> (i32, i32) {
    %c0_i32 = arith.constant 0 : i32
    %c0_i32_0 = arith.constant 0 : i32
    %c0_i32_1 = arith.constant 0 : i32
    return %c0_i32, %c0_i32_0 : i32, i32
  }
  func.func @transform_4(%arg0: i32) -> (i32, i32, i32) {
    %c0_i32 = arith.constant 0 : i32
    %c0_i32_0 = arith.constant 0 : i32
    %c0_i32_1 = arith.constant 0 : i32
    %c0_i32_2 = arith.constant 0 : i32
    return %c0_i32, %c0_i32_0, %c0_i32_1 : i32, i32, i32
  }
  func.func @transform_5(%arg0: i32) -> (i32, i32) {
    %c0_i32 = arith.constant 0 : i32
    %c0_i32_0 = arith.constant 0 : i32
    %c0_i32_1 = arith.constant 0 : i32
    return %c0_i32, %c0_i32_0 : i32, i32
  }
  func.func @transform_6(%arg0: i32) -> (i32, i32, i32) {
    %c0_i32 = arith.constant 0 : i32
    %c0_i32_0 = arith.constant 0 : i32
    %c0_i32_1 = arith.constant 0 : i32
    return %arg0, %c0_i32, %c0_i32_0 : i32, i32, i32
  }
}

</mosaic_0001>

<bundles_post_ra>
// kernel: fn.1
= control target key start
LH: loop header
LB: loop body
LE: loop exit
PB: predicated region body
PF: predicated region fallthrough
CT: control target
= control target key end

     0   :  { %11 = vsyncpa [#allocation4], 0  ;;  %s5293_s0 = inlined_call_operand.vmem [shape: bf16[2,28,16], index: 0, kind: input, shape index: {}]   ;;  %s5294_s1 = inlined_call_operand.vmem [shape: f32[5,16,1], index: 1, kind: input, shape index: {}]   ;;  %s5295_s2 = inlined_call_operand.vmem [shape: bf16[25,16,16], index: 2, kind: input, shape index: {}]   ;;  %s5296_s3 = inlined_call_operand.vmem [shape: f32[1,16], index: 3, kind: input, shape index: {}]   ;;  %s5297_s4 = inlined_call_operand.vmem [shape: bf16[25,16,16], index: 4, kind: input, shape index: {}]   ;;  %s5298_s5 = inlined_call_operand.vmem [shape: f32[1,16], index: 5, kind: input, shape index: {}]   ;;  %s5299_s6 = inlined_call_operand.hbm [shape: f32[2,16,16], index: 6, kind: output, shape index: {}]  }
   0x1   :  { %13 = vsyncpa [#allocation4 + $0x1], 0  ;;  %s4637_s21 = smov 0   ;;  %s4639_s22 = smov 0  }
   0x2   :  { %s4641_s23 = smov 0   ;;  %s4643_s24 = smov 0  }
   0x3 LB: > { %s4658_s25 = sadd.s32 4294967295, %s4594_s24   ;;  %s3577_s26 = sadd.s32 4294967294, %s4594_s24   ;;  %s4594_s24 = sphi %s4643_s24, %s5305_s24   ;;  %s4590_s23 = sphi %s4641_s23, %s5304_s23   ;;  %s4586_s22 = sphi %s4639_s22, %s5303_s22   ;;  %s4582_s21 = sphi %s4637_s21, %s5302_s21  }
   0x4   : > { %s4662_s27 = sadd.s32 1, %s4594_s24   ;;  %s157_s28 = sadd.s32 1, %s4590_s23 }
   0x5   : > { %s154_s29 = ssub.s32 %s4594_s24, %s4662_s27  ;;  %p167_p0 = scmp.ne.s32.totalorder %s4590_s23, %s4586_s22 }
   0x6   : > { %p155_p1 = scmp.eq.s32.totalorder %s154_s29, 0  ;;  %p168_p2 = scmp.eq.s32.totalorder %s4658_s25, 1 }
   0x7   : > { %p173_p3 = scmp.ne.s32.totalorder %s4586_s22, %s4582_s21  ;;  %p174_p4 = scmp.eq.s32.totalorder %s3577_s26, 1 }
   0x8   : > { %s4673_s30 = scalar_select %p155_p1, %s4590_s23, %s157_s28  }
   0x9   : > { %p4675_p5 = por %p168_p2, %p167_p0  ;;  %p4679_p6 = por %p174_p4, %p173_p3 }
   0xa   : > { %p3580_p7 = scmp.ge.s32.totalorder %s4594_s24, 1  ;;  %p215_p8 = scmp.lt.s32.totalorder %s4594_s24, 3 }
   0xc   : > { %p216_p9 = pnand %p3580_p7, %p215_p8 }
   0xd   : > { %v4445_v0 = vld [vmem:[%s5295_s2 + $0x28] sm:$0xff] (!%p216_p9)   ;;  %v4596_v1 = vmov (!%p216_p9), 0.0   ;;  %p245_p10 = scmp.lt.s32.totalorder (!%p216_p9), %s4658_s25, 1  ;;  %vm4597_vm0 = vmmov (!%p216_p9), 0   ;;  %v4449_v2 = vld [vmem:[%s5295_s2 + $0x30] sm:$0xff] (!%p216_p9)   ;;  %vm268_vm1 = vcmask (!%p216_p9), 1046528  }
   0xe   : > { %219 = sbr.rel (%p216_p9) target bundleno = 872 (0x368), region = 44  ;;  %3939 = vmatprep.subr.bf16.mxu0 (!%p216_p9), %v4596_v1  ;;  %3969 = vmatprep.subr.bf16.mxu1 (!%p216_p9), %v4596_v1  ;;  %vm278_vm2 = vcmask (!%p216_p9), 130048   ;;  %v4448_v7 = vld [vmem:[%s5295_s2] sm:$0xff] (!%p216_p9)   ;;  %vm592_vm3 = vsmask.f32 (!%p216_p9), 6400  ;;  %v4453_v24 = vld [vmem:[%s5295_s2 + $0x8] sm:$0xff] (!%p216_p9)  }
   0xf   : > { %3940 = vmatpush3.bf16.msra.mxu0 (!%p216_p9), %v4445_v0  ;;  %3941 = vmatprep.mubr.msk.bf16.mxu0 (!%p216_p9), %vm4597_vm0, %v4596_v1  ;;  %v4452_v36 = vld [vmem:[%s5295_s2 + $0x50] sm:$0xff] (!%p216_p9)   ;;  %vm663_vm4 = vsmask.f32 (!%p216_p9), 7424  ;;  %vm387_vm5 = vcmask (!%p216_p9), 1045504   ;;  %v4457_v45 = vld [vmem:[%s5295_s2 + $0x58] sm:$0xff] (!%p216_p9)   ;;  %vm454_vm7 = vcmask (!%p216_p9), 1044480  }
  0x10   : > { %3945 = vmatprep.subr.bf16.mxu0 (!%p216_p9), %v4596_v1  ;;  %3971 = vmatprep.mubr.msk.bf16.mxu1 (!%p216_p9), %vm4597_vm0, %v4596_v1  ;;  %v4456_v61 = vld [vmem:[%s5295_s2 + $0x78] sm:$0xff] (!%p216_p9)   ;;  %vm729_vm6 = vsmask.f32 (!%p216_p9), 5376  ;;  %v4598_v0 = vmov (!%p216_p9), 0   ;;  %vm1894_vm8 = vcmask (!%p216_p9), 125952   ;;  %vm1898_vm9 = vcmask (!%p216_p9), 123904  }
  0x11   : > { %3970 = vmatpush3.bf16.msra.mxu1 (!%p216_p9), %v4449_v2  ;;  %4443 = vset.pattern.permute.xlu0 (!%p216_p9), %v4598_v0  ;;  %1895 = vst.msk [vmem:[#allocation2] sm:$0xf] (!%p216_p9), %vm1894_vm8, %v4598_v0  ;;  %1896 = vst.msk [vmem:[#allocation2 + $0x4] sm:$0xf] (!%p216_p9), %vm1894_vm8, %v4598_v0  ;;  %vm803_vm10 = vsmask.f32 (!%p216_p9), 4352 }
  0x12   : > { %3975 = vmatprep.subr.bf16.mxu1 (!%p216_p9), %v4596_v1  ;;  %4444 = vset.pattern.permute.xlu1 (!%p216_p9), %v4598_v0  ;;  %1897 = vst.msk [vmem:[#allocation2 + $0x8] sm:$0xf] (!%p216_p9), %vm1894_vm8, %v4598_v0  ;;  %vm1917_vm13 = vcmask (!%p216_p9), 125955   ;;  %vm1906_vm14 = vcmask (!%p216_p9), 1042432   ;;  %vm1907_vm15 = vcmask (!%p216_p9), 1046532   ;;  %s242_s19 = sand.u32 (!%p216_p9), 1, %s4586_s22  }
  0x13   : > { %1899 = vst.msk [vmem:[#allocation2 + $0xc] sm:$0x3] (!%p216_p9), %vm1898_vm9, %v4598_v0  ;;  %vm1908_vm9 = vmor (!%p216_p9), %vm1906_vm14, %vm1907_vm15  ;;  %s3581_s20 = sshll.u32 (!%p216_p9), %s242_s19, 4  ;;  %s3838_s29 = sshll.u32 (!%p216_p9), %s4658_s25, 8 }
  0x14   : > { %s244_s9 = scalar_lea.vmem (!%p216_p9), [#allocation3], %s3581_s20  ;;  %s5246_s13 = scalar_lea.hbm (!%p216_p9), %s5299_s6, %s3838_s29 }
  0x15   : > { %s246_s11 = scalar_select %p245_p10, %s4658_s25, 1 }
  0x16   : > { %s3515_s10 = sshll.u32 %s244_s9, 4  ;;  %s5252_s25 = scalar_lea.sflag [#allocation4], %s242_s19  ;;  %s5248_s10 = int_to_ptr.vmem [resolvable:$true] %s3515_s10 }
  0x17   : > { %s3835_s14 = sshll.u32 %s246_s11, 4  ;;  %s4599_s15 = smov [#allocation3]  }
  0x18   : > { %s4703_s17 = scalar_lea.vmem %s5293_s0, %s3835_s14  ;;  %s4532_s14 = scalar_lea.vmem %s5248_s10, 256 }
  0x19   : > { %v4707_v3 = vld [vmem:[%s4703_s17 + $0x4] sm:$0xf]  ;;  %v255_v4 = vld [vmem:[%s4703_s17] sm:$0xe]  ;;  %v4763_v46 = vld [vmem:[%s4703_s17 + $0x8] sm:$0xf]  ;;  %p4533_p11 = scmp.ne.s32.totalorder %s5248_s10, %s4532_s14 }
  0x1a   : > { %v3586_v5 = vcombine.low %v255_v4, %v4707_v3  ;;  %v4447_v6 = vld [vmem:[%s4703_s17 + $0x8] ss:$0 sps:$4 sm:$0x11]   ;;  %v585_v13 = vld [vmem:[%s4703_s17] sm:$0xf]  ;;  %v3625_v53 = vcombine.low %v4763_v46, %v4763_v46  ;;  %s4536_s16 = sshll.u32 %s4599_s15, 4  ;;  %s4537_s16 = int_to_ptr.vmem [resolvable:$false] %s4536_s16 }
  0x1b   : > { %v4716_v8 = vld [vmem:[%s4703_s17 + $0x8] ss:$0 sps:$4 sm:$0x33]   ;;  %v270_v10 = vrot.slane %v4447_v6, 1  ;;  %v3616_v16 = vcombine.low %v585_v13, %v4707_v3  ;;  %v376_v26 = vld [vmem:[%s4703_s17] sm:$0xc]  ;;  %p4534_p12 = pnand %p4533_p11, %p4675_p5  ;;  %p4539_p0 = scmp.lt.s32.totalorder %s5248_s10, %s4537_s16 }
  0x1c   : > { %v269_v9 = vrot.slane %v3586_v5, 1  ;;  %v594_v11 = vshrl.u32 %v3586_v5, 16  ;;  %v597_v12 = vshll.u32 %v3586_v5, 16  ;;  %v602_v14 = vshrl.u32 %v4716_v8, 16  ;;  %v251_v28 = vld [vmem:[%s4703_s17] sm:$0xf] }
  0x1d   : > { %v605_v15 = vshll.u32 %v4716_v8, 16  ;;  %v667_v25 = vshll.u32 %v3616_v16, 16  ;;  %v3595_v29 = vcombine.low %v376_v26, %v4707_v3  ;;  %v665_v30 = vshrl.u32 %v3616_v16, 16  ;;  %v4744_v33 = vld [vmem:[%s4703_s17 + $0x8] ss:$0 sps:$4 sm:$0x77]   ;;  %p4535_p13 = pneg %p4534_p12 }
  0x1e   : > { %v4723_v17 = vsel %vm268_vm1, %v269_v9, %v270_v10  ;;  %v596_v18 = vrot.slane %v594_v11, 1  ;;  %v599_v19 = vrot.slane %v597_v12, 2  ;;  %v604_v20 = vrot.slane %v602_v14, 1  ;;  %v443_v35 = vld [vmem:[%s4703_s17] sm:$0x8] }
  0x1f   : > { %3942 = vmatmul.mubr.msk.bf16.vlgmr.msra.gmra.mrb[0].mxu0 %vm278_vm2, %v4723_v17  ;;  %v607_v21 = vrot.slane %v605_v15, 2  ;;  %v669_v31 = vrot.slane %v667_v25, 1  ;;  %v672_v32 = vshll.u32 %v4447_v6, 16  ;;  %v3590_v34 = vcombine.low %v251_v28, %v4707_v3  ;;  %v873_v55 = vld [vmem:[%s4703_s17 + $0x4] sm:$0xf]  ;;  %v570_v15 = vld [vmem:[%s5294_s1 + $0x8] sm:$0xff] }
  0x20   : > { %3946 = vmatpush3.bf16.msra.mxu0 %v4448_v7  ;;  %v600_v22 = vor.u32 %v599_v19, %v596_v18  ;;  %3947 = vmatprep.mubr.msk.bf16.mxu0 %vm4597_vm0, %v4596_v1  ;;  %v731_v37 = vshrl.u32 %v3595_v29, 16  ;;  %v734_v40 = vshll.u32 %v3595_v29, 16  ;;  %v739_v41 = vshrl.u32 %v4744_v33, 16  ;;  %v4774_v56 = vld [vmem:[%s4703_s17 + $0x8] sm:$0xf]  ;;  %v4461_v9 = vld [vmem:[%s5295_s2 + $0x80] sm:$0xff]  }
  0x21   : > { %v608_v23 = vor.u32 %v607_v21, %v604_v20  ;;  %3951 = vmatprep.subr.bf16.mxu0 %v4596_v1  ;;  %v670_v38 = vor.u32 %v669_v31, %v665_v30  ;;  %v674_v39 = vrot.slane %v672_v32, 1  ;;  %v742_v42 = vshll.u32 %v4744_v33, 16  ;;  %v4793_v6 = vld [vmem:[%s4703_s17 + $0xc] ss:$0 sps:$4 sm:$0x11]   ;;  %v569_v12 = vld [vmem:[%s5294_s1] sm:$0xff]  ;;  %578 = vperm.xlu1 %4444, %v570_v15  }
  0x22   : > { %v4755_v43 = vcombine.low %v443_v35, %v4707_v3  ;;  %v389_v44 = vrot.slane %v4716_v8, 2  ;;  %v388_v47 = vrot.slane %v3595_v29, 2  ;;  %v733_v48 = vrot.slane %v731_v37, 2  ;;  %v4807_v14 = vld [vmem:[%s4703_s17 + $0xc] ss:$0 sps:$4 sm:$0x33]   ;;  %573 = vperm.xlu0 %4443, %v569_v12  }
  0x23   : > { %v4735_v27 = vsel %vm592_vm3, %v600_v22, %v608_v23  ;;  %v675_v49 = vsel %vm663_vm4, %v670_v38, %v674_v39  ;;  %v736_v50 = vrot.slane %v734_v40, 3  ;;  %v741_v51 = vrot.slane %v739_v41, 2  ;;  %v3634_v19 = vld [vmem:[%s5294_s1 + $0x10] sm:$0xff]  ;;  %v3635_v20 = vld [vmem:[%s5294_s1 + $0x18] sm:$0xff]  ;;  %v1752_v22 = vld [vmem:[%s4703_s17 + $0x4] sm:$0xc] }
  0x24   : > { %3972 = vmatmul.mubr.msk.bf16.vlgmr.msra.gmra.mrb[0].mxu1 %vm278_vm2, %v4735_v27  ;;  %v744_v52 = vrot.slane %v742_v42, 3  ;;  %v805_v54 = vshrl.u32 %v4755_v43, 16  ;;  %v808_v57 = vshll.u32 %v4755_v43, 16  ;;  %v813_v58 = vshrl.u32 %v3625_v53, 16  ;;  %v3657_v26 = vld [vmem:[%s5294_s1 + $0x20] sm:$0xff]  ;;  %v3681_v37 = vld [vmem:[%s5294_s1 + $0x38] sm:$0xff] }
  0x25   : > { %3976 = vmatpush3.bf16.msra.mxu1 %v4453_v24  ;;  %3977 = vmatprep.mubr.msk.bf16.mxu1 %vm4597_vm0, %v4596_v1  ;;  %v816_v59 = vshll.u32 %v3625_v53, 16  ;;  %v4782_v60 = vsel %vm387_vm5, %v388_v47, %v389_v44  ;;  %v455_v62 = vrot.slane %v4755_v43, 3  ;;  %v4789_v63 = vcombine.low %v873_v55, %v4774_v56  ;;  %v4460_v28 = vld [vmem:[%s5295_s2 + $0xa0] sm:$0xff]   ;;  %v4465_v38 = vld [vmem:[%s5295_s2 + $0xa8] sm:$0xff]   ;;  %v4464_v42 = vld [vmem:[%s5295_s2 + $0x38] sm:$0xff]  }
  0x26   : > { %3981 = vmatprep.subr.bf16.mxu1 %v4596_v1  ;;  %v737_v2 = vor.u32 %v736_v50, %v733_v48  ;;  %v745_v4 = vor.u32 %v744_v52, %v741_v51  ;;  %v456_v5 = vrot.slane %v4744_v33, 3  ;;  %v807_v7 = vrot.slane %v805_v54, 3  ;;  %956 = vperm.xlu0 %4443, %v3634_v19   ;;  %v3658_v33 = vld [vmem:[%s5294_s1 + $0x28] sm:$0xff]  ;;  %v3703_v40 = vld [vmem:[%s5294_s1 + $0x40] sm:$0xff]  ;;  %v4471_v47 = vld [vmem:[%s5295_s2 + $0x18] sm:$0xff]  }
  0x27   : > { %v810_v8 = vrot.slane %v808_v57, 4  ;;  %v815_v10 = vrot.slane %v813_v58, 3  ;;  %v818_v11 = vrot.slane %v816_v59, 4  ;;  %v890_v13 = vshll.u32 %v4789_v63, 16  ;;  %961 = vperm.xlu1 %4444, %v3635_v20   ;;  %v3704_v41 = vld [vmem:[%s5294_s1 + $0x48] sm:$0xff]  ;;  %v4470_v48 = vld [vmem:[%s5295_s2 + $0x60] sm:$0xff]  }
  0x28   : > { %v4816_v16 = vsel %vm729_vm6, %v737_v2, %v745_v4  ;;  %v895_v18 = vshll.u32 %v4793_v6, 16  ;;  %v1760_v21 = vrot.slane %v4807_v14, 2  ;;  %v3700_v23 = vcombine.low %v1752_v22, %v4774_v56  ;;  %v1172_v50 = vld [vmem:[%s4703_s17 + $0x4] sm:$0xe]  ;;  %v4474_v51 = vld [vmem:[%s5295_s2 + $0xb0] sm:$0xff]   ;;  %v4478_v53 = vld [vmem:[%s5295_s2 + $0xb8] sm:$0xff]  }
  0x29   : > { %v4835_v25 = vsel %vm454_vm7, %v455_v62, %v456_v5  ;;  %v888_v29 = vshrl.u32 %v4789_v63, 16  ;;  %v892_v30 = vrot.slane %v890_v13, 1  ;;  %v819_v35 = vor.u32 %v818_v11, %v815_v10  ;;  %v4477_v4 = vld [vmem:[%s5295_s2 + $0x48] sm:$0xff]   ;;  %v4482_v10 = vld [vmem:[%s5295_s2 + $0x98] sm:$0xff]   ;;  %s4538_s17 = scalar_lea.vmem %s4537_s16, 512 }
  0x2a   : > { %v1759_v24 = vrot.slane %v3700_v23, 2  ;;  %v897_v31 = vrot.slane %v895_v18, 1  ;;  %1239 = vperm.xlu0 %4443, %v3657_v26   ;;  %v4880_v43 = vcombine.low %v4707_v3, %v4763_v46  ;;  %v4469_v3 = vld [vmem:[%s5295_s2 + $0x40] sm:$0xff]   ;;  %v4468_v46 = vld [vmem:[%s5295_s2 + $0x10] sm:$0xff]   ;;  %v3654_v52 = vcombine.low %v1172_v50, %v4774_v56  ;;  %p4540_p1 = scmp.lt.s32.totalorder %s4538_s17, %s4532_s14 }
  0x2b   : > { %3948 = vmatmul.mubr.msk.bf16.vlgmr.msra.gmra.mrb[0].mxu0 %vm278_vm2, %v3590_v34  ;;  %v811_v34 = vor.u32 %v810_v8, %v807_v7  ;;  %1244 = vperm.xlu1 %4444, %v3658_v33   ;;  %v893_v44 = vor.u32 %v892_v30, %v888_v29  ;;  %v1471_v57 = vshrl.u32 %v4807_v14, 16  ;;  %v1474_v58 = vshll.u32 %v4807_v14, 16  ;;  %v4480_v8 = vld [vmem:[%s5295_s2 + $0x20] sm:$0xff]  }
  0x2c   : > { %3952 = vmatpush3.bf16.msra.mxu0 %v4452_v36  ;;  %3953 = vmatprep.mubr.msk.bf16.mxu0 %vm4597_vm0, %v4596_v1  ;;  %v4845_v32 = vsel %vm387_vm5, %v1759_v24, %v1760_v21  ;;  %v3680_v36 = vld [vmem:[%s5294_s1 + $0x30] sm:$0xff]  ;;  %v1463_v54 = vshrl.u32 %v3654_v52, 16  ;;  %v1466_v55 = vshll.u32 %v3654_v52, 16  ;;  %v1179_v56 = vrot.slane %v3654_v52, 1  ;;  %p4541_p2 = por %p4540_p1, %p4539_p0 }
  0x2d   : > { %3957 = vmatprep.subr.bf16.mxu0 %v4596_v1  ;;  %v820_v39 = vsel %vm803_vm10, %v811_v34, %v819_v35  ;;  %v1180_v59 = vrot.slane %v4793_v6, 1  ;;  %v1473_v63 = vrot.slane %v1471_v57, 1  ;;  %v1476_v0 = vrot.slane %v1474_v58, 2 }
  0x2e   : > { %1536 = vperm.xlu0 %4443, %v3680_v36   ;;  %v1468_v62 = vrot.slane %v1466_v55, 2  ;;  %v3705_v55 = vld [vmem:[%s5296_s3] ss:$0 sm:$0xff]  ;;  %p4542_p3 = pnand %p4541_p2, %p4535_p13 }
  0x2f   : > { %1541 = vperm.xlu1 %4444, %v3681_v37   ;;  %v1181_v2 = vsel %vm268_vm1, %v1179_v56, %v1180_v59  ;;  %v1477_v7 = vor.u32 %v1476_v0, %v1473_v63 }
  0x30   : > { %3978 = vmatmul.mubr.msk.bf16.vlgmr.msra.gmra.mrb[0].mxu1 %vm278_vm2, %v675_v49  ;;  %v4473_v49 = vld [vmem:[%s5295_s2 + $0x68] sm:$0xff]  }
  0x31   : > { %3982 = vmatpush3.bf16.msra.mxu1 %v4457_v45  ;;  %3983 = vmatprep.mubr.msk.bf16.mxu1 %vm4597_vm0, %v4596_v1  ;;  %v898_v45 = vsel %vm663_vm4, %v893_v44, %v897_v31  ;;  %v4484_v31 = vld [vmem:[%s5297_s4 + $0x28] sm:$0xff]  }
  0x32   : > { %3987 = vmatprep.subr.bf16.mxu1 %v4596_v1  ;;  %1819 = vperm.xlu0 %4443, %v3703_v40  }
  0x33   : > { %1824 = vperm.xlu1 %4444, %v3704_v41  }
  0x36   : > { %2240 = vperm.xlu0 %4443, %v569_v12  }
  0x37   : > { %3954 = vmatmul.mubr.msk.bf16.vlgmr.msra.gmra.mrb[0].mxu0 %vm278_vm2, %v4782_v60  ;;  %2245 = vperm.xlu1 %4444, %v570_v15  }
  0x38   : > { %3958 = vmatpush3.bf16.msra.mxu0 %v4456_v61  ;;  %3959 = vmatprep.mubr.msk.bf16.mxu0 %vm4597_vm0, %v4596_v1  ;;  %v1465_v61 = vrot.slane %v1463_v54, 1 }
  0x39   : > { %3963 = vmatprep.subr.bf16.mxu0 %v4596_v1 }
  0x3a   : > { %2618 = vperm.xlu0 %4443, %v3634_v19   ;;  %v1469_v5 = vor.u32 %v1468_v62, %v1465_v61 }
  0x3b   : > { %2623 = vperm.xlu1 %4444, %v3635_v20  }
  0x3c   : > { %3984 = vmatmul.mubr.msk.bf16.vlgmr.msra.gmra.mrb[0].mxu1 %vm278_vm2, %v4816_v16  ;;  %v1478_v6 = vsel %vm592_vm3, %v1469_v5, %v1477_v7 }
  0x3d   : > { %3988 = vmatpush3.bf16.msra.mxu1 %v4461_v9  ;;  %3989 = vmatprep.mubr.msk.bf16.mxu1 %vm4597_vm0, %v4596_v1  ;;  %v4481_v9 = vld [vmem:[%s5295_s2 + $0x70] sm:$0xff]  }
  0x3e   : > { %3993 = vmatprep.subr.bf16.mxu1 %v4596_v1  ;;  %2900 = vperm.xlu0 %4443, %v3657_v26  }
  0x3f   : > { %2905 = vperm.xlu1 %4444, %v3658_v33  }
  0x42   : > { %3196 = vperm.xlu0 %4443, %v3680_v36  }
  0x43   : > { %3960 = vmatmul.mubr.msk.bf16.vlgmr.msra.gmra.mrb[0].mxu0 %vm278_vm2, %v4835_v25  ;;  %3201 = vperm.xlu1 %4444, %v3681_v37  }
  0x44   : > { %3964 = vmatpush3.bf16.msra.mxu0 %v4460_v28  ;;  %3965 = vmatprep.mubr.msk.bf16.mxu0 %vm4597_vm0, %v4596_v1 }
  0x45   : > { %3999 = vmatprep.subr.bf16.mxu0 %v4596_v1 }
  0x46   : > { %3478 = vperm.xlu0 %4443, %v3703_v40  }
  0x47   : > { %3483 = vperm.xlu1 %4444, %v3704_v41  }
  0x48   : > { %3990 = vmatmul.mubr.msk.bf16.vlgmr.msra.gmra.mrb[0].mxu1 %vm278_vm2, %v820_v39 }
  0x49   : > { %3994 = vmatpush3.bf16.msra.mxu1 %v4465_v38  ;;  %3995 = vmatprep.mubr.msk.bf16.mxu1 %vm4597_vm0, %v4596_v1 }
  0x4a   : > { %4029 = vmatprep.subr.bf16.mxu1 %v4596_v1 }
  0x4f   : > { %3966 = vmatmul.mubr.msk.bf16.vlgmr.msra.gmra.mrb[0].mxu0 %vm278_vm2, %v4880_v43 }
  0x50   : > { %4000 = vmatpush3.bf16.msra.mxu0 %v4464_v42  ;;  %4001 = vmatprep.mubr.msk.bf16.mxu0 %vm4597_vm0, %v4596_v1  ;;  %v4488_v42 = vld [vmem:[%s5297_s4 + $0x30] sm:$0xff]  }
  0x51   : > { %4005 = vmatprep.subr.bf16.mxu0 %v4596_v1 }
  0x54   : > { %3996 = vmatmul.mubr.msk.bf16.vlgmr.msra.gmra.mrb[0].mxu1 %vm278_vm2, %v898_v45 }
  0x55   : > { %4030 = vmatpush3.bf16.msra.mxu1 %v4469_v3  ;;  %4031 = vmatprep.mubr.msk.bf16.mxu1 %vm4597_vm0, %v4596_v1 }
  0x56   : > { %4035 = vmatprep.subr.bf16.mxu1 %v4596_v1 }
  0x57   : > { %4002 = vmatmul.mubr.msk.bf16.vlgmr.msra.gmra.mrb[4].mxu0 %vm278_vm2, %v4782_v60 }
  0x58   : > { %4006 = vmatpush3.bf16.msra.mxu0 %v4468_v46  ;;  %4007 = vmatprep.mubr.msk.bf16.mxu0 %vm4597_vm0, %v4596_v1 }
  0x59   : > { %4011 = vmatprep.subr.bf16.mxu0 %v4596_v1 }
  0x5c   : > { %4032 = vmatmul.mubr.msk.bf16.vlgmr.msra.gmra.mrb[4].mxu1 %vm278_vm2, %v4816_v16 }
  0x5d   : > { %4036 = vmatpush3.bf16.msra.mxu1 %v4471_v47  ;;  %4037 = vmatprep.mubr.msk.bf16.mxu1 %vm4597_vm0, %v4596_v1 }
  0x5e   : > { %4041 = vmatprep.subr.bf16.mxu1 %v4596_v1 }
  0x63   : > { %4008 = vmatmul.mubr.msk.bf16.vlgmr.msra.gmra.mrb[4].mxu0 %vm278_vm2, %v4723_v17  ;;  %v4472_v17 = vld [vmem:[%s5295_s2 + $0x88] sm:$0xff]  }
  0x64   : > { %4012 = vmatpush3.bf16.msra.mxu0 %v4470_v48  ;;  %4013 = vmatprep.mubr.msk.bf16.mxu0 %vm4597_vm0, %v4596_v1 }
  0x65   : > { %4017 = vmatprep.subr.bf16.mxu0 %v4596_v1 }
  0x68   : > { %4038 = vmatmul.mubr.msk.bf16.vlgmr.msra.gmra.mrb[4].mxu1 %vm278_vm2, %v4735_v27  ;;  %v4475_v27 = vld [vmem:[%s5295_s2 + $0x90] sm:$0xff]  }
  0x69   : > { %4042 = vmatpush3.bf16.msra.mxu1 %v4473_v49  ;;  %4043 = vmatprep.mubr.msk.bf16.mxu1 %vm4597_vm0, %v4596_v1 }
  0x6a   : > { %4047 = vmatprep.subr.bf16.mxu1 %v4596_v1 }
  0x6f   : > { %4014 = vmatmul.mubr.msk.bf16.vlgmr.msra.gmra.mrb[4].mxu0 %vm278_vm2, %v4835_v25 }
  0x70   : > { %4018 = vmatpush3.bf16.msra.mxu0 %v4472_v17  ;;  %4019 = vmatprep.mubr.msk.bf16.mxu0 %vm4597_vm0, %v4596_v1 }
  0x71   : > { %4023 = vmatprep.subr.bf16.mxu0 %v4596_v1 }
  0x74   : > { %4044 = vmatmul.mubr.msk.bf16.vlgmr.msra.gmra.mrb[4].mxu1 %vm278_vm2, %v820_v39 }
  0x75   : > { %4048 = vmatpush3.bf16.msra.mxu1 %v4475_v27  ;;  %4049 = vmatprep.mubr.msk.bf16.mxu1 %vm4597_vm0, %v4596_v1 }
  0x76   : > { %4053 = vmatprep.subr.bf16.mxu1 %v4596_v1 }
  0x7b   : > { %4020 = vmatmul.mubr.msk.bf16.vlgmr.msra.gmra.mrb[4].mxu0 %vm278_vm2, %v4880_v43 }
  0x7c   : > { %4024 = vmatpush3.bf16.msra.mxu0 %v4474_v51  ;;  %4025 = vmatprep.mubr.msk.bf16.mxu0 %vm4597_vm0, %v4596_v1 }
  0x7d   : > { %4059 = vmatprep.subr.bf16.mxu0 %v4596_v1 }
  0x80   : > { %4050 = vmatmul.mubr.msk.bf16.vlgmr.msra.gmra.mrb[4].mxu1 %vm278_vm2, %v898_v45 }
  0x81   : > { %4054 = vmatpush3.bf16.msra.mxu1 %v4478_v53  ;;  %4055 = vmatprep.mubr.msk.bf16.mxu1 %vm4597_vm0, %v4596_v1 }
  0x82   : > { %4089 = vmatprep.subr.bf16.mxu1 %v4596_v1 }
  0x87   : > { %4026 = vmatmul.mubr.msk.bf16.vlgmr.msra.gmra.mrb[4].mxu0 %vm278_vm2, %v1181_v2 }
  0x88   : > { %4060 = vmatpush3.bf16.msra.mxu0 %v4477_v4  ;;  %4061 = vmatprep.mubr.msk.bf16.mxu0 %vm4597_vm0, %v4596_v1 }
  0x89   : > { %4065 = vmatprep.subr.bf16.mxu0 %v4596_v1 }
  0x8c   : > { %4056 = vmatmul.mubr.msk.bf16.vlgmr.msra.gmra.mrb[4].mxu1 %vm278_vm2, %v1478_v6 }
  0x8d   : > { %4091 = vmatprep.mubr.msk.bf16.mxu1 %vm4597_vm0, %v4596_v1  ;;  %4090 = vmatpush3.bf16.msra.mxu1 %v4484_v31 }
  0x8e   : > { %4095 = vmatprep.subr.bf16.mxu1 %v4596_v1 }
  0x8f   : > { %4062 = vmatmul.mubr.msk.bf16.vlgmr.msra.gmra.mrb[8].mxu0 %vm278_vm2, %v4835_v25 }
  0x90   : > { %4066 = vmatpush3.bf16.msra.mxu0 %v4480_v8  ;;  %4067 = vmatprep.mubr.msk.bf16.mxu0 %vm4597_vm0, %v4596_v1 }
  0x91   : > { %4071 = vmatprep.subr.bf16.mxu0 %v4596_v1 }
  0x9b   : > { %4068 = vmatmul.mubr.msk.bf16.vlgmr.msra.gmra.mrb[8].mxu0 %vm278_vm2, %v4782_v60  ;;  %v4483_v60 = vld [vmem:[%s5295_s2 + $0xc0] sm:$0xff]  }
  0x9c   : > { %4072 = vmatpush3.bf16.msra.mxu0 %v4481_v9  ;;  %4073 = vmatprep.mubr.msk.bf16.mxu0 %vm4597_vm0, %v4596_v1 }
  0x9d   : > { %4077 = vmatprep.subr.bf16.mxu0 %v4596_v1 }
  0xa0   : > { %v579_v12 = vpop.permute.xlu1 %578 }
  0xa1   : > { %v574_v11 = vpop.permute.xlu0 %573 }
  0xa5   : > { %v957_v18 = vpop.permute.xlu0 %956 }
  0xa6   : > { %v962_v20 = vpop.permute.xlu1 %961 }
  0xa7   : > { %4074 = vmatmul.mubr.msk.bf16.vlgmr.msra.gmra.mrb[8].mxu0 %vm278_vm2, %v4880_v43 }
  0xa8   : > { %4078 = vmatpush3.bf16.msra.mxu0 %v4482_v10  ;;  %4079 = vmatprep.mubr.msk.bf16.mxu0 %vm4597_vm0, %v4596_v1 }
  0xa9   : > { %4083 = vmatprep.subr.bf16.mxu0 %v4596_v1 }
  0xaa   : > { %v1245_v33 = vpop.permute.xlu1 %1244 }
  0xae   : > { %v1542_v45 = vpop.permute.xlu1 %1541 }
  0xb2   : > { %v1825_v54 = vpop.permute.xlu1 %1824 }
  0xb3   : > { %4080 = vmatmul.mubr.msk.bf16.vlgmr.msra.gmra.mrb[8].mxu0 %vm278_vm2, %v1181_v2 }
  0xb4   : > { %4084 = vmatpush3.bf16.msra.mxu0 %v4483_v60  ;;  %4085 = vmatprep.mubr.msk.bf16.mxu0 %vm4597_vm0, %v4596_v1 }
  0xb5   : > { %4119 = vmatprep.subr.bf16.mxu0 %v4596_v1 }
  0xbf   : > { %4086 = vmatmul.mubr.msk.bf16.vlgmr.msra.gmra.mrb[8].mxu0 %vm278_vm2, %v4845_v32  ;;  %v1240_v32 = vpop.permute.xlu0 %1239 }
  0xc0   : > { %4121 = vmatprep.mubr.msk.bf16.mxu0 %vm4597_vm0, %v4596_v1  ;;  %4120 = vmatpush3.bf16.msra.mxu0 %v4488_v42 }
  0xc1   : > { %4125 = vmatprep.subr.bf16.mxu0 %v4596_v1 }
  0xc3   : > { %v1537_v41 = vpop.permute.xlu0 %1536 }
  0xc7   : > { %v1820_v50 = vpop.permute.xlu0 %1819 }
 0x122   : > { %v560_v13 = vpop.f32.mrb[0].mxu0 }
 0x123   : > { %v3967_v14 = vpop.f32.mrb[1].mxu0  ;;  %v581_v21 = vmul.f32 %v574_v11, %v560_v13 }
 0x124   : > { %v563_v15 = vpop.f32.mrb[2].mxu0 }
 0x125   : > { %v3968_v16 = vpop.f32.mrb[3].mxu0  ;;  %v582_v25 = vmul.f32 %v579_v12, %v563_v15 }
 0x127   : > { %v942_v19 = vpop.f32.mrb[0].mxu1 }
 0x128   : > { %v964_v22 = vmul.f32 %v957_v18, %v942_v19  ;;  %v3997_v23 = vpop.f32.mrb[1].mxu1 }
 0x129   : > { %v945_v24 = vpop.f32.mrb[2].mxu1 }
 0x12a   : > { %v966_v26 = vadd.f32 %v964_v22, %v581_v21  ;;  %v965_v28 = vmul.f32 %v962_v20, %v945_v24  ;;  %v3998_v29 = vpop.f32.mrb[3].mxu1 }
 0x12c   : > { %v967_v30 = vadd.f32 %v965_v28, %v582_v25 }
 0x15a   : > { %v1225_v34 = vpop.f32.mrb[4].mxu0 }
 0x15b   : > { %v1247_v35 = vmul.f32 %v1240_v32, %v1225_v34  ;;  %v4027_v36 = vpop.f32.mrb[5].mxu0 }
 0x15c   : > { %v1228_v37 = vpop.f32.mrb[6].mxu0 }
 0x15d   : > { %v1249_v38 = vadd.f32 %v1247_v35, %v966_v26  ;;  %v1248_v39 = vmul.f32 %v1245_v33, %v1228_v37  ;;  %v4028_v40 = vpop.f32.mrb[7].mxu0 }
 0x15f   : > { %v1250_v43 = vadd.f32 %v1248_v39, %v967_v30  ;;  %v1522_v44 = vpop.f32.mrb[4].mxu1 }
 0x160   : > { %v1544_v3 = vmul.f32 %v1537_v41, %v1522_v44  ;;  %v4057_v46 = vpop.f32.mrb[5].mxu1 }
 0x161   : > { %v1525_v47 = vpop.f32.mrb[6].mxu1 }
 0x162   : > { %v1546_v48 = vadd.f32 %v1544_v3, %v1249_v38  ;;  %v1545_v49 = vmul.f32 %v1542_v45, %v1525_v47  ;;  %v4058_v17 = vpop.f32.mrb[7].mxu1 }
 0x164   : > { %v1547_v27 = vadd.f32 %v1545_v49, %v1250_v43 }
 0x192   : > { %v1805_v51 = vpop.f32.mrb[8].mxu0 }
 0x193   : > { %v1827_v52 = vmul.f32 %v1820_v50, %v1805_v51  ;;  %v4087_v53 = vpop.f32.mrb[9].mxu0 }
 0x194   : > { %v1808_v57 = vpop.f32.mrb[10].mxu0 }
 0x195   : > { %v1829_v58 = vadd.f32 %v1827_v52, %v1546_v48  ;;  %v1828_v56 = vmul.f32 %v1825_v54, %v1808_v57  ;;  %v4088_v59 = vpop.f32.mrb[11].mxu0 }
 0x197   : > { %v1838_v61 = vadd.f32 %v3705_v55, %v1829_v58  ;;  %v1830_v62 = vadd.f32 %v1828_v56, %v1547_v27 }
 0x199   : > { %v1842_v63 = vmul.f32 0.70710677, %v1838_v61  ;;  %v1839_v0 = vadd.f32 %v3705_v55, %v1830_v62  ;;  %v1840_v45 = vmul.f32 0.5, %v1838_v61  ;;  %v4487_v62 = vld [vmem:[%s5297_s4] sm:$0xff]  }
 0x19b   : > { %v1844_v2 = vand.u32 2147483647, %v1842_v63  ;;  %v1843_v4 = vmul.f32 0.70710677, %v1839_v0  ;;  %vm1884_vm11 = vcmp.ge.f32.partialorder %v1842_v63, 0.0  ;;  %v1841_v49 = vmul.f32 0.5, %v1839_v0 }
 0x19d   : > { %v1846_v5 = vmul.f32 0.3275911, %v1844_v2  ;;  %v1845_v7 = vand.u32 2147483647, %v1843_v4  ;;  %v1872_v10 = vsub.f32 0.0, %v1844_v2  ;;  %vm1885_vm12 = vcmp.ge.f32.partialorder %v1843_v4, 0.0 }
 0x19f   : > { %v1848_v6 = vadd.f32 1.0, %v1846_v5  ;;  %v1847_v8 = vmul.f32 0.3275911, %v1845_v7  ;;  %v1873_v60 = vsub.f32 0.0, %v1845_v7  ;;  %v1874_v12 = vmul.f32 %v1872_v10, %v1844_v2 }
 0x1a1   : > { %4524 = vrcp.f32 %v1848_v6  ;;  %v1849_v9 = vadd.f32 1.0, %v1847_v8  ;;  %v1875_v16 = vmul.f32 %v1873_v60, %v1845_v7  ;;  %v1876_v18 = vmul.f32 1.442695, %v1874_v12 }
 0x1a3   : > { %4526 = vrcp.f32 %v1849_v9  ;;  %v1878_v23 = vmul.f32 1.442695, %v1875_v16  ;;  %v4492_v16 = vld [vmem:[%s5297_s4 + $0x8] sm:$0xff]  }
 0x1a4   : > { %4528 = vpow2.f32 %v1876_v18 }
 0x1a5   : > { %4530 = vpow2.f32 %v1878_v23 }
 0x1ab   : > { %v4525_v11 = vpop.eup %4524 }
 0x1ac   : > { %v1854_v13 = vmul.f32 1.0614054, %v4525_v11 }
 0x1ad   : > { %v4527_v14 = vpop.eup %4526 }
 0x1ae   : > { %v1856_v15 = vadd.f32 -1.4531521, %v1854_v13  ;;  %v1855_v19 = vmul.f32 1.0614054, %v4527_v14  ;;  %v4529_v35 = vpop.eup %4528 }
 0x1af   : > { %v4531_v39 = vpop.eup %4530 }
 0x1b0   : > { %v1858_v20 = vmul.f32 %v4525_v11, %v1856_v15  ;;  %v1857_v21 = vadd.f32 -1.4531521, %v1855_v19 }
 0x1b2   : > { %v1860_v22 = vadd.f32 1.4214138, %v1858_v20  ;;  %v1859_v24 = vmul.f32 %v4527_v14, %v1857_v21 }
 0x1b4   : > { %v1862_v25 = vmul.f32 %v4525_v11, %v1860_v22  ;;  %v1861_v26 = vadd.f32 1.4214138, %v1859_v24  ;;  %v4491_v22 = vld [vmem:[%s5297_s4 + $0x50] sm:$0xff]  }
 0x1b6   : > { %v1864_v28 = vadd.f32 -0.28449672, %v1862_v25  ;;  %v1863_v29 = vmul.f32 %v4527_v14, %v1861_v26 }
 0x1b8   : > { %v1866_v30 = vmul.f32 %v4525_v11, %v1864_v28  ;;  %v1865_v31 = vadd.f32 -0.28449672, %v1863_v29 }
 0x1ba   : > { %v1868_v32 = vadd.f32 0.2548296, %v1866_v30  ;;  %v1867_v33 = vmul.f32 %v4527_v14, %v1865_v31 }
 0x1bc   : > { %v1870_v34 = vmul.f32 %v4525_v11, %v1868_v32  ;;  %v1869_v36 = vadd.f32 0.2548296, %v1867_v33  ;;  %v4496_v32 = vld [vmem:[%s5297_s4 + $0x58] sm:$0xff]  }
 0x1be   : > { %v1880_v37 = vmul.f32 %v4529_v35, %v1870_v34  ;;  %v1871_v38 = vmul.f32 %v4527_v14, %v1869_v36 }
 0x1c0   : > { %v1882_v40 = vsub.f32 1.0, %v1880_v37  ;;  %v1881_v41 = vmul.f32 %v4531_v39, %v1871_v38 }
 0x1c2   : > { %v1886_v42 = vsub.f32 0.0, %v1882_v40  ;;  %v1883_v43 = vsub.f32 1.0, %v1881_v41 }
 0x1c4   : > { %v1888_v44 = vsel %vm1884_vm11, %v1882_v40, %v1886_v42  ;;  %v1887_v46 = vsub.f32 0.0, %v1883_v43  ;;  %vm1920_vm11 = vcmask 124928  }
 0x1c5   : > { %v1890_v3 = vadd.f32 1.0, %v1888_v44  ;;  %v4495_v44 = vld [vmem:[%s5297_s4 + $0x78] sm:$0xff]  }
 0x1c6   : > { %v1889_v48 = vsel %vm1885_vm12, %v1883_v43, %v1887_v46 }
 0x1c7   : > { %v1892_v47 = vmul.f32 %v1890_v3, %v1840_v45  ;;  %v1891_v17 = vadd.f32 1.0, %v1889_v48 }
 0x1c9   : > { %v3836_v27 = vpack.c.bf16 %v1892_v47, %v1892_v47  ;;  %v1893_v50 = vmul.f32 %v1891_v17, %v1841_v49 }
 0x1cb   : > { %v1909_v51 = vrot.slane %v3836_v27, 5  ;;  %v3837_v52 = vpack.c.bf16 %v1893_v50, %v1893_v50  ;;  %v4500_v27 = vld [vmem:[%s5297_s4 + $0x80] sm:$0xff]  }
 0x1cd   : > { %v1910_v53 = vrot.slane %v1909_v51, 4  ;;  %1918 = vst.msk [vmem:[#allocation2] sm:$0x8] %vm1917_vm13, %v1909_v51  ;;  %v1911_v54 = vrot.slane %v3837_v52, 5 }
 0x1cf   : > { %v1912_v55 = vsel %vm1908_vm9, %v1910_v53, %v1911_v54  ;;  %v1913_v57 = vrot.slane %v1911_v54, 4 }
 0x1d0   : > { %1919 = vst.msk [vmem:[#allocation2 + $0x4] sm:$0xf] %vm1894_vm8, %v1912_v55 }
 0x1d1   : > { %1921 = vst.msk [vmem:[#allocation2 + $0x8] sm:$0x7] %vm1920_vm11, %v1913_v57 }
 0x1d4   : > { %v1926_v56 = vld [vmem:[#allocation2] sm:$0xe] }
 0x1d5   : > { %v2252_v60 = vld [vmem:[#allocation2] sm:$0xf] }
 0x1d6   : > { %v1922_v21 = vld [vmem:[#allocation2] sm:$0xf] }
 0x1d7   : > { %v5021_v58 = vld [vmem:[#allocation2 + $0x4] sm:$0xf]  ;;  %v2045_v26 = vld [vmem:[#allocation2] sm:$0xc] }
 0x1d8   : > { %v3710_v59 = vcombine.low %v1926_v56, %v5021_v58  ;;  %v4486_v61 = vld [vmem:[#allocation2 + $0x8] ss:$0 sps:$4 sm:$0x11]   ;;  %v3740_v13 = vcombine.low %v2252_v60, %v5021_v58  ;;  %v3714_v23 = vcombine.low %v1922_v21, %v5021_v58  ;;  %v3719_v28 = vcombine.low %v2045_v26, %v5021_v58  ;;  %v2111_v3 = vld [vmem:[#allocation2] sm:$0x8]  ;;  %v4513_v26 = vld [vmem:[%s5297_s4 + $0xb0] sm:$0xff]  }
 0x1d9   : > { %v5027_v63 = vld [vmem:[#allocation2 + $0x8] ss:$0 sps:$4 sm:$0x33]   ;;  %v1940_v2 = vrot.slane %v4486_v61, 1  ;;  %v2337_v25 = vshll.u32 %v4486_v61, 16  ;;  %v3725_v47 = vcombine.low %v2111_v3, %v5021_v58  ;;  %v4508_v21 = vld [vmem:[%s5297_s4 + $0x40] sm:$0xff]  }
 0x1da   : > { %v1939_v0 = vrot.slane %v3710_v59, 1  ;;  %v2260_v4 = vshrl.u32 %v3710_v59, 16  ;;  %v2263_v5 = vshll.u32 %v3710_v59, 16  ;;  %v2268_v7 = vshrl.u32 %v5027_v63, 16  ;;  %v2177_v45 = vld [vmem:[#allocation2 + $0x8] sm:$0xf] }
 0x1db   : > { %v2271_v6 = vshll.u32 %v5027_v63, 16  ;;  %v2332_v19 = vshll.u32 %v3740_v13, 16  ;;  %v2330_v24 = vshrl.u32 %v3740_v13, 16  ;;  %v4497_v30 = vld [vmem:[#allocation2 + $0x8] ss:$0 sps:$4 sm:$0x77]   ;;  %v3749_v17 = vcombine.low %v2177_v45, %v2177_v45 }
 0x1dc   : > { %v5032_v8 = vsel %vm268_vm1, %v1939_v0, %v1940_v2  ;;  %v2262_v9 = vrot.slane %v2260_v4, 1  ;;  %v2265_v10 = vrot.slane %v2263_v5, 2  ;;  %v2270_v11 = vrot.slane %v2268_v7, 1  ;;  %v2536_v0 = vld [vmem:[#allocation2 + $0x4] sm:$0xf] }
 0x1dd   : > { %4092 = vmatmul.mubr.msk.bf16.vlgmr.msra.gmra.mrb[8].mxu1 %vm278_vm2, %v5032_v8  ;;  %v2273_v12 = vrot.slane %v2271_v6, 2  ;;  %v2334_v20 = vrot.slane %v2332_v19, 1  ;;  %v2339_v31 = vrot.slane %v2337_v25, 1  ;;  %v2395_v33 = vshrl.u32 %v3719_v28, 16  ;;  %v5092_v2 = vld [vmem:[#allocation2 + $0x8] sm:$0xf] }
 0x1de   : > { %4096 = vmatpush3.bf16.msra.mxu1 %v4487_v62  ;;  %v2266_v14 = vor.u32 %v2265_v10, %v2262_v9  ;;  %4097 = vmatprep.mubr.msk.bf16.mxu1 %vm4597_vm0, %v4596_v1  ;;  %v2398_v35 = vshll.u32 %v3719_v28, 16  ;;  %v2403_v36 = vshrl.u32 %v4497_v30, 16  ;;  %v2406_v37 = vshll.u32 %v4497_v30, 16  ;;  %v4504_v9 = vld [vmem:[%s5297_s4 + $0xa8] sm:$0xff]  }
 0x1df   : > { %v2274_v15 = vor.u32 %v2273_v12, %v2270_v11  ;;  %4101 = vmatprep.subr.bf16.mxu1 %v4596_v1  ;;  %v2335_v29 = vor.u32 %v2334_v20, %v2330_v24  ;;  %v2056_v38 = vrot.slane %v3719_v28, 2  ;;  %v2057_v39 = vrot.slane %v5027_v63, 2  ;;  %v4499_v63 = vld [vmem:[%s5297_s4 + $0xa0] sm:$0xff]   ;;  %v5110_v11 = vld [vmem:[#allocation2 + $0xc] ss:$0 sps:$4 sm:$0x11]  }
 0x1e0   : > { %v2397_v40 = vrot.slane %v2395_v33, 2  ;;  %v2400_v41 = vrot.slane %v2398_v35, 3  ;;  %v2405_v42 = vrot.slane %v2403_v36, 2  ;;  %v2408_v43 = vrot.slane %v2406_v37, 3  ;;  %v4509_v24 = vld [vmem:[%s5297_s4 + $0x60] sm:$0xff]   ;;  %v4512_v25 = vld [vmem:[%s5297_s4 + $0x68] sm:$0xff]  }
 0x1e1   : > { %v5044_v18 = vsel %vm592_vm3, %v2266_v14, %v2274_v15  ;;  %v2340_v34 = vsel %vm663_vm4, %v2335_v29, %v2339_v31  ;;  %v5073_v46 = vsel %vm387_vm5, %v2056_v38, %v2057_v39  ;;  %v2468_v50 = vshrl.u32 %v3725_v47, 16  ;;  %v4503_v14 = vld [vmem:[%s5297_s4 + $0x38] sm:$0xff]   ;;  %v2834_v28 = vld [vmem:[#allocation2 + $0x4] sm:$0xe] }
 0x1e2   : > { %4122 = vmatmul.mubr.msk.bf16.vlgmr.msra.gmra.mrb[12].mxu0 %vm278_vm2, %v5044_v18  ;;  %v2401_v48 = vor.u32 %v2400_v41, %v2397_v40  ;;  %v2409_v49 = vor.u32 %v2408_v43, %v2405_v42  ;;  %v2471_v52 = vshll.u32 %v3725_v47, 16  ;;  %v2476_v53 = vshrl.u32 %v3749_v17, 16  ;;  %v4517_v31 = vld [vmem:[%s5297_s4 + $0xb8] sm:$0xff]   ;;  %v4516_v42 = vld [vmem:[%s5297_s4 + $0x48] sm:$0xff]  }
 0x1e3   : > { %4126 = vmatpush3.bf16.msra.mxu0 %v4492_v16  ;;  %4127 = vmatprep.mubr.msk.bf16.mxu0 %vm4597_vm0, %v4596_v1  ;;  %v2479_v54 = vshll.u32 %v3749_v17, 16  ;;  %v2122_v55 = vrot.slane %v3725_v47, 3  ;;  %v2123_v57 = vrot.slane %v4497_v30, 3  ;;  %v2470_v56 = vrot.slane %v2468_v50, 3  ;;  %v4519_v47 = vld [vmem:[%s5297_s4 + $0x20] sm:$0xff]  }
 0x1e4   : > { %4131 = vmatprep.subr.bf16.mxu0 %v4596_v1  ;;  %v2410_v51 = vsel %vm729_vm6, %v2401_v48, %v2409_v49  ;;  %v2473_v59 = vrot.slane %v2471_v52, 4  ;;  %v2478_v61 = vrot.slane %v2476_v53, 3  ;;  %v3754_v6 = vcombine.low %v2536_v0, %v5092_v2  ;;  %v4518_v30 = vld [vmem:[#allocation2 + $0xc] ss:$0 sps:$4 sm:$0x33]   ;;  %v4520_v48 = vld [vmem:[%s5297_s4 + $0x70] sm:$0xff]   ;;  %v2241_v53 = vpop.permute.xlu0 %2240 }
 0x1e5   : > { %v2481_v62 = vrot.slane %v2479_v54, 4  ;;  %v5095_v4 = vsel %vm454_vm7, %v2122_v55, %v2123_v57  ;;  %v2558_v13 = vshll.u32 %v5110_v11, 16  ;;  %v5118_v15 = vcombine.low %v5021_v58, %v2177_v45  ;;  %v4507_v58 = vld [vmem:[%s5297_s4 + $0x10] sm:$0xff]   ;;  %v4521_v49 = vld [vmem:[%s5297_s4 + $0x98] sm:$0xff]   ;;  %v3412_v17 = vld [vmem:[#allocation2 + $0x4] sm:$0xc]  ;;  %v2246_v55 = vpop.permute.xlu1 %2245 }
 0x1e6   : > { %v2474_v5 = vor.u32 %v2473_v59, %v2470_v56  ;;  %v2553_v60 = vshll.u32 %v3754_v6, 16  ;;  %v2551_v16 = vshrl.u32 %v3754_v6, 16  ;;  %v3778_v29 = vcombine.low %v2834_v28, %v5092_v2 }
 0x1e7   : > { %v2482_v7 = vor.u32 %v2481_v62, %v2478_v61  ;;  %v2560_v20 = vrot.slane %v2558_v13, 1  ;;  %v3135_v35 = vshll.u32 %v4518_v30, 16  ;;  %v2842_v37 = vrot.slane %v5110_v11, 1 }
 0x1e8   : > { %v2555_v12 = vrot.slane %v2553_v60, 1  ;;  %v3127_v33 = vshll.u32 %v3778_v29, 16  ;;  %v2841_v36 = vrot.slane %v3778_v29, 1  ;;  %v2619_v61 = vpop.permute.xlu0 %2618 }
 0x1e9   : > { %4098 = vmatmul.mubr.msk.bf16.vlgmr.msra.gmra.mrb[8].mxu1 %vm278_vm2, %v3714_v23  ;;  %v2483_v10 = vsel %vm803_vm10, %v2474_v5, %v2482_v7  ;;  %v4510_v23 = vld [vmem:[%s5297_s4 + $0x18] sm:$0xff]   ;;  %v3137_v41 = vrot.slane %v3135_v35, 2  ;;  %v3829_v35 = vld [vmem:[%s5298_s5] ss:$0 sm:$0xff] }
 0x1ea   : > { %4102 = vmatpush3.bf16.msra.mxu1 %v4491_v22  ;;  %4103 = vmatprep.mubr.msk.bf16.mxu1 %vm4597_vm0, %v4596_v1  ;;  %v2556_v19 = vor.u32 %v2555_v12, %v2551_v16  ;;  %v3129_v39 = vrot.slane %v3127_v33, 2  ;;  %v2843_v43 = vsel %vm268_vm1, %v2841_v36, %v2842_v37 }
 0x1eb   : > { %4107 = vmatprep.subr.bf16.mxu1 %v4596_v1 }
 0x1ec   : > { %v2561_v22 = vsel %vm663_vm4, %v2556_v19, %v2560_v20  ;;  %v2901_v60 = vpop.permute.xlu0 %2900 }
 0x1ee   : > { %4128 = vmatmul.mubr.msk.bf16.vlgmr.msra.gmra.mrb[12].mxu0 %vm278_vm2, %v2340_v34  ;;  %v3132_v34 = vshrl.u32 %v4518_v30, 16 }
 0x1ef   : > { %4132 = vmatpush3.bf16.msra.mxu0 %v4496_v32  ;;  %4133 = vmatprep.mubr.msk.bf16.mxu0 %vm4597_vm0, %v4596_v1  ;;  %v3124_v32 = vshrl.u32 %v3778_v29, 16 }
 0x1f0   : > { %4137 = vmatprep.subr.bf16.mxu0 %v4596_v1  ;;  %v3134_v40 = vrot.slane %v3132_v34, 1 }
 0x1f1   : > { %v3126_v38 = vrot.slane %v3124_v32, 1 }
 0x1f2   : > { %v3138_v45 = vor.u32 %v3137_v41, %v3134_v40 }
 0x1f5   : > { %4104 = vmatmul.mubr.msk.bf16.vlgmr.msra.gmra.mrb[8].mxu1 %vm278_vm2, %v5073_v46 }
 0x1f6   : > { %4108 = vmatpush3.bf16.msra.mxu1 %v4495_v44  ;;  %4109 = vmatprep.mubr.msk.bf16.mxu1 %vm4597_vm0, %v4596_v1  ;;  %v3130_v44 = vor.u32 %v3129_v39, %v3126_v38 }
 0x1f7   : > { %4113 = vmatprep.subr.bf16.mxu1 %v4596_v1 }
 0x1f8   : > { %v3139_v3 = vsel %vm592_vm3, %v3130_v44, %v3138_v45 }
 0x1fa   : > { %4134 = vmatmul.mubr.msk.bf16.vlgmr.msra.gmra.mrb[12].mxu0 %vm278_vm2, %v2410_v51 }
 0x1fb   : > { %4138 = vmatpush3.bf16.msra.mxu0 %v4500_v27  ;;  %4139 = vmatprep.mubr.msk.bf16.mxu0 %vm4597_vm0, %v4596_v1  ;;  %v3824_v27 = vcombine.low %v3412_v17, %v5092_v2 }
 0x1fc   : > { %4143 = vmatprep.subr.bf16.mxu0 %v4596_v1 }
 0x1fd   : > { %v3419_v50 = vrot.slane %v3824_v27, 2 }
 0x201   : > { %4110 = vmatmul.mubr.msk.bf16.vlgmr.msra.gmra.mrb[8].mxu1 %vm278_vm2, %v5095_v4 }
 0x202   : > { %4114 = vmatpush3.bf16.msra.mxu1 %v4499_v63  ;;  %4115 = vmatprep.mubr.msk.bf16.mxu1 %vm4597_vm0, %v4596_v1 }
 0x203   : > { %4149 = vmatprep.subr.bf16.mxu1 %v4596_v1 }
 0x206   : > { %4140 = vmatmul.mubr.msk.bf16.vlgmr.msra.gmra.mrb[12].mxu0 %vm278_vm2, %v2483_v10 }
 0x207   : > { %4144 = vmatpush3.bf16.msra.mxu0 %v4504_v9  ;;  %4145 = vmatprep.mubr.msk.bf16.mxu0 %vm4597_vm0, %v4596_v1 }
 0x208   : > { %4179 = vmatprep.subr.bf16.mxu0 %v4596_v1 }
 0x20d   : > { %4116 = vmatmul.mubr.msk.bf16.vlgmr.msra.gmra.mrb[8].mxu1 %vm278_vm2, %v5118_v15 }
 0x20e   : > { %4150 = vmatpush3.bf16.msra.mxu1 %v4503_v14  ;;  %4151 = vmatprep.mubr.msk.bf16.mxu1 %vm4597_vm0, %v4596_v1 }
 0x20f   : > { %4155 = vmatprep.subr.bf16.mxu1 %v4596_v1 }
 0x212   : > { %4146 = vmatmul.mubr.msk.bf16.vlgmr.msra.gmra.mrb[12].mxu0 %vm278_vm2, %v2561_v22 }
 0x213   : > { %4180 = vmatpush3.bf16.msra.mxu0 %v4508_v21  ;;  %4181 = vmatprep.mubr.msk.bf16.mxu0 %vm4597_vm0, %v4596_v1  ;;  %v3197_v21 = vpop.permute.xlu0 %3196 }
 0x214   : > { %4185 = vmatprep.subr.bf16.mxu0 %v4596_v1 }
 0x215   : > { %4152 = vmatmul.mubr.msk.bf16.vlgmr.msra.gmra.mrb[12].mxu1 %vm278_vm2, %v5073_v46 }
 0x216   : > { %4156 = vmatpush3.bf16.msra.mxu1 %v4507_v58  ;;  %4157 = vmatprep.mubr.msk.bf16.mxu1 %vm4597_vm0, %v4596_v1 }
 0x217   : > { %4161 = vmatprep.subr.bf16.mxu1 %v4596_v1 }
 0x21a   : > { %4182 = vmatmul.mubr.msk.bf16.vlgmr.msra.gmra.mrb[16].mxu0 %vm278_vm2, %v2410_v51  ;;  %v3420_v51 = vrot.slane %v4518_v30, 2  ;;  %v3479_v30 = vpop.permute.xlu0 %3478 }
 0x21b   : > { %4186 = vmatpush3.bf16.msra.mxu0 %v4510_v23  ;;  %4187 = vmatprep.mubr.msk.bf16.mxu0 %vm4597_vm0, %v4596_v1 }
 0x21c   : > { %4191 = vmatprep.subr.bf16.mxu0 %v4596_v1  ;;  %v3421_v52 = vsel %vm387_vm5, %v3419_v50, %v3420_v51 }
 0x221   : > { %4158 = vmatmul.mubr.msk.bf16.vlgmr.msra.gmra.mrb[12].mxu1 %vm278_vm2, %v5032_v8  ;;  %v4511_v8 = vld [vmem:[%s5297_s4 + $0x88] sm:$0xff]  }
 0x222   : > { %4162 = vmatpush3.bf16.msra.mxu1 %v4509_v24  ;;  %4163 = vmatprep.mubr.msk.bf16.mxu1 %vm4597_vm0, %v4596_v1 }
 0x223   : > { %4167 = vmatprep.subr.bf16.mxu1 %v4596_v1 }
 0x226   : > { %4188 = vmatmul.mubr.msk.bf16.vlgmr.msra.gmra.mrb[16].mxu0 %vm278_vm2, %v5044_v18  ;;  %v4514_v18 = vld [vmem:[%s5297_s4 + $0x90] sm:$0xff]  }
 0x227   : > { %4192 = vmatpush3.bf16.msra.mxu0 %v4512_v25  ;;  %4193 = vmatprep.mubr.msk.bf16.mxu0 %vm4597_vm0, %v4596_v1 }
 0x228   : > { %4197 = vmatprep.subr.bf16.mxu0 %v4596_v1 }
 0x22d   : > { %4164 = vmatmul.mubr.msk.bf16.vlgmr.msra.gmra.mrb[12].mxu1 %vm278_vm2, %v5095_v4 }
 0x22e   : > { %4168 = vmatpush3.bf16.msra.mxu1 %v4511_v8  ;;  %4169 = vmatprep.mubr.msk.bf16.mxu1 %vm4597_vm0, %v4596_v1 }
 0x22f   : > { %4173 = vmatprep.subr.bf16.mxu1 %v4596_v1 }
 0x232   : > { %4194 = vmatmul.mubr.msk.bf16.vlgmr.msra.gmra.mrb[16].mxu0 %vm278_vm2, %v2483_v10 }
 0x233   : > { %4198 = vmatpush3.bf16.msra.mxu0 %v4514_v18  ;;  %4199 = vmatprep.mubr.msk.bf16.mxu0 %vm4597_vm0, %v4596_v1 }
 0x234   : > { %4203 = vmatprep.subr.bf16.mxu0 %v4596_v1 }
 0x239   : > { %4170 = vmatmul.mubr.msk.bf16.vlgmr.msra.gmra.mrb[12].mxu1 %vm278_vm2, %v5118_v15 }
 0x23a   : > { %4174 = vmatpush3.bf16.msra.mxu1 %v4513_v26  ;;  %4175 = vmatprep.mubr.msk.bf16.mxu1 %vm4597_vm0, %v4596_v1 }
 0x23b   : > { %4209 = vmatprep.subr.bf16.mxu1 %v4596_v1 }
 0x23e   : > { %4200 = vmatmul.mubr.msk.bf16.vlgmr.msra.gmra.mrb[16].mxu0 %vm278_vm2, %v2561_v22 }
 0x23f   : > { %4204 = vmatpush3.bf16.msra.mxu0 %v4517_v31  ;;  %4205 = vmatprep.mubr.msk.bf16.mxu0 %vm4597_vm0, %v4596_v1 }
 0x245   : > { %4176 = vmatmul.mubr.msk.bf16.vlgmr.msra.gmra.mrb[12].mxu1 %vm278_vm2, %v2843_v43 }
 0x246   : > { %4210 = vmatpush3.bf16.msra.mxu1 %v4516_v42  ;;  %4211 = vmatprep.mubr.msk.bf16.mxu1 %vm4597_vm0, %v4596_v1 }
 0x247   : > { %4215 = vmatprep.subr.bf16.mxu1 %v4596_v1 }
 0x24a   : > { %4206 = vmatmul.mubr.msk.bf16.vlgmr.msra.gmra.mrb[16].mxu0 %vm278_vm2, %v3139_v3 }
 0x24d   : > { %4212 = vmatmul.mubr.msk.bf16.vlgmr.msra.gmra.mrb[16].mxu1 %vm278_vm2, %v5095_v4 }
 0x24e   : > { %4216 = vmatpush3.bf16.msra.mxu1 %v4519_v47  ;;  %4217 = vmatprep.mubr.msk.bf16.mxu1 %vm4597_vm0, %v4596_v1 }
 0x24f   : > { %4221 = vmatprep.subr.bf16.mxu1 %v4596_v1 }
 0x259   : > { %4218 = vmatmul.mubr.msk.bf16.vlgmr.msra.gmra.mrb[16].mxu1 %vm278_vm2, %v5073_v46  ;;  %v4522_v46 = vld [vmem:[%s5297_s4 + $0xc0] sm:$0xff]  }
 0x25a   : > { %4222 = vmatpush3.bf16.msra.mxu1 %v4520_v48  ;;  %4223 = vmatprep.mubr.msk.bf16.mxu1 %vm4597_vm0, %v4596_v1 }
 0x25b   : > { %4227 = vmatprep.subr.bf16.mxu1 %v4596_v1 }
 0x265   : > { %4224 = vmatmul.mubr.msk.bf16.vlgmr.msra.gmra.mrb[16].mxu1 %vm278_vm2, %v5118_v15 }
 0x266   : > { %4228 = vmatpush3.bf16.msra.mxu1 %v4521_v49  ;;  %4229 = vmatprep.mubr.msk.bf16.mxu1 %vm4597_vm0, %v4596_v1 }
 0x267   : > { %4233 = vmatprep.subr.bf16.mxu1 %v4596_v1 }
 0x271   : > { %4230 = vmatmul.mubr.msk.bf16.vlgmr.msra.gmra.mrb[16].mxu1 %vm278_vm2, %v2843_v43 }
 0x272   : > { %4234 = vmatpush3.bf16.msra.mxu1 %v4522_v46  ;;  %4235 = vmatprep.mubr.msk.bf16.mxu1 %vm4597_vm0, %v4596_v1  ;;  %v2624_v1 = vpop.permute.xlu1 %2623 }
 0x276   : > { %v2906_v12 = vpop.permute.xlu1 %2905 }
 0x27a   : > { %v3202_v25 = vpop.permute.xlu1 %3201 }
 0x27d   : > { %4236 = vmatmul.mubr.msk.bf16.vlgmr.msra.gmra.mrb[16].mxu1 %vm278_vm2, %v3421_v52 }
 0x27e   : > { %v3484_v34 = vpop.permute.xlu1 %3483 }
 0x2e0   : > { %v2227_v54 = vpop.f32.mrb[8].mxu1 }
 0x2e1   : > { %v4117_v57 = vpop.f32.mrb[9].mxu1  ;;  %v2248_v63 = vmul.f32 %v2241_v53, %v2227_v54 }
 0x2e2   : > { %v2230_v56 = vpop.f32.mrb[10].mxu1 }
 0x2e3   : > { %v4118_v59 = vpop.f32.mrb[11].mxu1  ;;  %v2249_v2 = vmul.f32 %v2246_v55, %v2230_v56 }
 0x2e5   : > { %v2605_v62 = vpop.f32.mrb[12].mxu0 }
 0x2e6   : > { %v2626_v0 = vmul.f32 %v2619_v61, %v2605_v62  ;;  %v4147_v4 = vpop.f32.mrb[13].mxu0 }
 0x2e7   : > { %v2608_v5 = vpop.f32.mrb[14].mxu0 }
 0x2e8   : > { %v2628_v7 = vadd.f32 %v2626_v0, %v2248_v63  ;;  %v2627_v6 = vmul.f32 %v2624_v1, %v2608_v5  ;;  %v4148_v9 = vpop.f32.mrb[15].mxu0 }
 0x2ea   : > { %v2629_v10 = vadd.f32 %v2627_v6, %v2249_v2 }
 0x318   : > { %v2887_v11 = vpop.f32.mrb[12].mxu1 }
 0x319   : > { %v2908_v13 = vmul.f32 %v2901_v60, %v2887_v11  ;;  %v4177_v14 = vpop.f32.mrb[13].mxu1 }
 0x31a   : > { %v2890_v15 = vpop.f32.mrb[14].mxu1 }
 0x31b   : > { %v2910_v16 = vadd.f32 %v2908_v13, %v2628_v7  ;;  %v2909_v19 = vmul.f32 %v2906_v12, %v2890_v15  ;;  %v4178_v20 = vpop.f32.mrb[15].mxu1 }
 0x31d   : > { %v2911_v22 = vadd.f32 %v2909_v19, %v2629_v10  ;;  %v3183_v58 = vpop.f32.mrb[16].mxu0 }
 0x31e   : > { %v3204_v23 = vmul.f32 %v3197_v21, %v3183_v58  ;;  %v4207_v24 = vpop.f32.mrb[17].mxu0 }
 0x31f   : > { %v3186_v8 = vpop.f32.mrb[18].mxu0 }
 0x320   : > { %v3206_v18 = vadd.f32 %v3204_v23, %v2910_v16  ;;  %v3205_v26 = vmul.f32 %v3202_v25, %v3186_v8  ;;  %v4208_v28 = vpop.f32.mrb[19].mxu0 }
 0x322   : > { %v3207_v29 = vadd.f32 %v3205_v26, %v2911_v22 }
 0x350   : > { %v3465_v31 = vpop.f32.mrb[16].mxu1 }
 0x351   : > { %v3486_v32 = vmul.f32 %v3479_v30, %v3465_v31  ;;  %v4237_v33 = vpop.f32.mrb[17].mxu1 }
 0x352   : > { %v3468_v36 = vpop.f32.mrb[18].mxu1 }
 0x353   : > { %v3488_v37 = vadd.f32 %v3486_v32, %v3206_v18  ;;  %v3487_v38 = vmul.f32 %v3484_v34, %v3468_v36  ;;  %v4238_v39 = vpop.f32.mrb[19].mxu1 }
 0x355   : > { %v3497_v40 = vadd.f32 %v3829_v35, %v3488_v37  ;;  %v3489_v41 = vadd.f32 %v3487_v38, %v3207_v29 }
 0x357   : > { %3499 = vst.msk [vmem:[%s244_s9] sm:$0xff] %vm278_vm2, %v3497_v40  ;;  %v3498_v42 = vadd.f32 %v3829_v35, %v3489_v41 }
 0x359   : > { %3500 = vst.msk [vmem:[%s244_s9 + $0x8] sm:$0xff] %vm278_vm2, %v3498_v42 }
 0x35a   : > { %4545 = shalt.err (!%p4542_p3)
}
 0x35b   : > { %s4546_s18 = scalar_lea.hbm %s5246_s13, 256  ;;  %s4550_s26 = scalar_lea.hbm %s5299_s6, 512 }
 0x35c   : > { %p4547_p4 = scmp.ne.s32.totalorder %s5246_s13, %s4546_s18  ;;  %p4551_p9 = scmp.lt.u32.totalorder %s5246_s13, %s5299_s6 }
 0x35d   : > { %p4552_p10 = scmp.lt.u32.totalorder %s4550_s26, %s4546_s18  ;;  %p4554_p12 = scmp.lt.u32.totalorder %s4546_s18, %s5246_s13 }
 0x35e   : > { %p4548_p7 = pnand %p4547_p4, %p4675_p5 }
 0x35f   : > { %p4553_p11 = por %p4552_p10, %p4551_p9 }
 0x360   : > { %p4549_p8 = pneg %p4548_p7 }
 0x361   : > { %p4555_p13 = por %p4554_p12, %p4553_p11 }
 0x363   : > { %p4556_p0 = pnand %p4555_p13, %p4549_p8 }
 0x365   : > { %4559 = shalt.err (!%p4556_p0)
}
 0x366   : > { %s4600_s9 = smov 128   ;;  %s4601_s11 = smov 8  }
 0x367   : > { %4399 = dma.vmem_to_hbm [thread:$0]  (%p4675_p5), %s5248_s10, 256, %s5246_s13, %s5252_s25, %s4600_s9, %s4600_s9, %s4601_s11  }
 0x368 PF: > { %p4405_p1 = scmp.ge.s32.totalorder %s4594_s24, 2  ;;  %s3530_s12 = sand.u32 1, %s4582_s21  }
 0x369   : > { %s3531_s14 = scalar_lea.sflag [#allocation4], %s3530_s12 }
 0x36a   : > { %p4402_p2 = pnand %p4405_p1, %p4679_p6 }
 0x36c   : > { %4577 = dma.done.wait (!%p4402_p2), %s3531_s14, 256  }
 0x36d   : > { %4579 = vsyncadd (!%p4402_p2), %s3531_s14, 4294967040  ;;  %p16_p3 = scmp.ge.s32.totalorder %s4662_s27, 4   ;;  %s5302_s21 = smov %s4586_s22 }
 0x36e   : > { %s5303_s22 = smov %s4590_s23  ;;  %s5304_s23 = smov %s4673_s30 }
 0x36f   : > { %s5305_s24 = smov %s4662_s27  ;;  %18 = sbr.rel (!%p16_p3) target bundleno = 3 (0x3), region = 131 }
 0x376   :  { %3536 = vsyncpa [#allocation4], 1 }
 0x377   :  { %3538 = vsyncpa [#allocation4 + $0x1], 1 }

</bundles_post_ra>
